<compile_context>
chip_gen: v7x
topology: tpu7x:2x2x1
jax: 0.10.0
libtpu: 0.0.40
codegen_flags: <defaults>
</compile_context>

<pallas_src>
import numpy as np
import jax
import jax.numpy as jnp
from jax.experimental import pallas as pl
from jax.experimental.pallas import tpu as pltpu

# Small, TPU-friendly stand-ins for the module constants
# (original: feature_size=302, query_size=600, classes=len(concepts) from a pickle).
N_NODES   = 64     # total nodes across the batch of graphs
N_GRAPHS  = 8      # number of graphs (values taken by `batch`)
FEATURES  = 128    # feature_size
QUERY_DIM = 128    # query_size
CLASSES   = 16     # classes
# TODO(synk): `classes` originally comes from a pickled Conversations object; fixed to 16 here.

LEAKY_SLOPE = 0.2                       # GATConv default negative_slope (python float!)
NEG_BIAS = -1e30                        # additive mask value (applied in the wrapper)
INV_SQRT_Q = float(1.0 / np.sqrt(QUERY_DIM))   # python float -> jaxpr literal


# ----------------------------- fused Pallas kernel -------------------------- #

def _graph_inferencer_kernel(x_ref, adj_bias_ref, w_ref, a_src_ref, a_dst_ref,
                             b_ref, q_ref, seg_bias_ref, wq_ref, lw_ref, lb_ref,
                             o_ref):
    """3x (GATConv + ReLU) with shared weights, then attention pooling + ReLU + Linear.

    Everything stays in VMEM for the whole forward pass (single pallas_call)."""
    x        = x_ref[...]                                   # [N, F]   f32
    adj_bias = adj_bias_ref[...]                            # [N, N]   f32 (0 / -1e30)
    w_bf     = w_ref[...].astype(jnp.bfloat16)              # [F, F]   shared GAT weight
    a_src    = a_src_ref[...]                               # [1, F]
    a_dst    = a_dst_ref[...]                               # [1, F]
    b        = b_ref[...]                                   # [1, F]

    # --- three applications of the *same* GATConv, each followed by ReLU ----
    for _ in range(3):
        # h = x @ W^T   (PyG lin_src) — bf16 operands, f32 accumulation
        h = jax.lax.dot_general(x.astype(jnp.bfloat16), w_bf,
                                (((1,), (1,)), ((), ())),
                                preferred_element_type=jnp.float32)     # [N, F]
        # per-node attention terms (tiny vector matmuls, kept in f32):
        #   e_src[j] = h[j]·a_src ,  e_dst[i] = h[i]·a_dst
        e_src = jax.lax.dot_general(a_src, h, (((1,), (1,)), ((), ())),
                                    preferred_element_type=jnp.float32)  # [1, N]
        e_dst = jax.lax.dot_general(h, a_dst, (((1,), (1,)), ((), ())),
                                    preferred_element_type=jnp.float32)  # [N, 1]
        scores = e_dst + e_src                                           # [N, N] (i=dst, j=src)
        scores = jnp.where(scores >= 0, scores, LEAKY_SLOPE * scores)    # LeakyReLU(0.2)
        # additive mask: exp(-1e30 - m) underflows to exactly 0 (self-loops
        # guarantee a finite row max), so no second where is needed.
        masked = scores + adj_bias
        m = jnp.max(masked, axis=-1, keepdims=True)
        p = jnp.exp(masked - m)
        denom = jnp.sum(p, axis=-1, keepdims=True)
        alpha = p * pl.reciprocal(denom, approx=True)                    # edge softmax
        agg = jax.lax.dot_general(alpha.astype(jnp.bfloat16), h.astype(jnp.bfloat16),
                                  (((1,), (0,)), ((), ())),
                                  preferred_element_type=jnp.float32)    # [N, F]
        x = jnp.maximum(agg + b, 0.0)                                    # fused F.relu

    # --- attention readout (per-graph softmax pooling) + ReLU + Linear ------
    q = q_ref[...]                                                       # [B, Q]
    # logits[b, n] = (query[b] @ W @ x[n]) / sqrt(decoder_dim)
    qa = jax.lax.dot_general(q.astype(jnp.bfloat16), wq_ref[...].astype(jnp.bfloat16),
                             (((1,), (0,)), ((), ())),
                             preferred_element_type=jnp.float32)         # [B, F]
    logits = jax.lax.dot_general(qa.astype(jnp.bfloat16), x.astype(jnp.bfloat16),
                                 (((1,), (1,)), ((), ())),
                                 preferred_element_type=jnp.float32)     # [B, N]
    logits = logits * INV_SQRT_Q + seg_bias_ref[...]
    m = jnp.max(logits, axis=-1, keepdims=True)
    p = jnp.exp(logits - m)
    weights = p * pl.reciprocal(jnp.sum(p, axis=-1, keepdims=True), approx=True)
    # scatter_add(weights * x, index)  ==  weights @ x
    pooled = jax.lax.dot_general(weights.astype(jnp.bfloat16), x.astype(jnp.bfloat16),
                                 (((1,), (0,)), ((), ())),
                                 preferred_element_type=jnp.float32)     # [B, F]
    pooled = jnp.maximum(pooled, 0.0)                                    # F.relu after attention
    out = jax.lax.dot_general(pooled.astype(jnp.bfloat16), lw_ref[...].astype(jnp.bfloat16),
                              (((1,), (1,)), ((), ())),
                              preferred_element_type=jnp.float32) + lb_ref[...]
    o_ref[...] = out                                                     # [B, classes]


# ------------------------------ wrapper ------------------------------------ #

_VMEM = pl.BlockSpec(memory_space=pltpu.MemorySpace.VMEM)   # whole array resident in VMEM


def graph_inferencer_forward(params, x, adj, query, seg):
    # precompute additive bias masks once (0 on edges / in-graph, -1e30 elsewhere)
    adj_bias = jnp.where(adj > 0, 0.0, NEG_BIAS).astype(jnp.float32)
    seg_bias = jnp.where(seg > 0, 0.0, NEG_BIAS).astype(jnp.float32)
    return pl.pallas_call(
        _graph_inferencer_kernel,
        out_shape=jax.ShapeDtypeStruct((query.shape[0], params["lin_w"].shape[0]),
                                       jnp.float32),
        in_specs=[_VMEM] * 11,
        out_specs=_VMEM,
    )(x, adj_bias, params["gat_w"], params["gat_a_src"], params["gat_a_dst"],
      params["gat_b"], query, seg_bias, params["att_w"], params["lin_w"],
      params["lin_b"])
    # TODO(synk): at production sizes (large N), tile the N x N score softmax over a
    # "parallel" grid axis (online softmax) so it fits v7x's 64 MiB VMEM and uses both TCs.


# ------------------------- pure-JAX reference ------------------------------ #

def _reference_forward(params, x, adj, query, seg):
    hp = jax.lax.Precision.HIGHEST
    for _ in range(3):
        h = jnp.einsum("nf,gf->ng", x, params["gat_w"], precision=hp)
        e_src = jnp.einsum("nf,of->no", h, params["gat_a_src"], precision=hp)  # [N,1]
        e_dst = jnp.einsum("nf,of->no", h, params["gat_a_dst"], precision=hp)  # [N,1]
        s = e_dst + e_src.T
        s = jnp.where(s >= 0, s, LEAKY_SLOPE * s)
        s = jnp.where(adj > 0, s, -1e30)
        a = jax.nn.softmax(s, axis=-1) * (adj > 0)
        a = a / jnp.sum(a, axis=-1, keepdims=True)
        x = jax.nn.relu(jnp.einsum("nm,mf->nf", a, h, precision=hp) + params["gat_b"])
    qa = jnp.einsum("bq,qf->bf", query, params["att_w"], precision=hp)
    logits = jnp.einsum("bf,nf->bn", qa, x, precision=hp) / np.sqrt(QUERY_DIM)
    logits = jnp.where(seg > 0, logits, -1e30)
    w = jax.nn.softmax(logits, axis=-1) * (seg > 0)
    w = w / jnp.sum(w, axis=-1, keepdims=True)
    pooled = jax.nn.relu(jnp.einsum("bn,nf->bf", w, x, precision=hp))
    return jnp.einsum("bf,cf->bc", pooled, params["lin_w"], precision=hp) + params["lin_b"]


# --------------------------------- main ------------------------------------ #

if __name__ == "__main__":
    key = jax.random.PRNGKey(0)
    ks = jax.random.split(key, 10)

    # deterministic parameter init (synthetic; shapes follow the module's __init__)
    params = {
        "gat_w":     jax.random.normal(ks[0], (FEATURES, FEATURES), jnp.float32) / np.sqrt(FEATURES),
        "gat_a_src": jax.random.normal(ks[1], (1, FEATURES), jnp.float32) / np.sqrt(FEATURES),
        "gat_a_dst": jax.random.normal(ks[2], (1, FEATURES), jnp.float32) / np.sqrt(FEATURES),
        "gat_b":     0.01 * jax.random.normal(ks[3], (1, FEATURES), jnp.float32),
        "att_w":     jax.random.uniform(ks[4], (QUERY_DIM, FEATURES), jnp.float32) / QUERY_DIM,
        "lin_w":     jax.random.normal(ks[5], (CLASSES, FEATURES), jnp.float32) / np.sqrt(FEATURES),
        "lin_b":     0.01 * jax.random.normal(ks[6], (1, CLASSES), jnp.float32),
    }
    # (unused heads of the original module: ablationlin, test1..3, superlin — not in forward)

    # inputs
    x = jax.random.normal(ks[7], (N_NODES, FEATURES), jnp.float32)
    query = jax.random.normal(ks[8], (N_GRAPHS, QUERY_DIM), jnp.float32)

    # graph structure: B graphs of P nodes each, ring edges within each graph
    P = N_NODES // N_GRAPHS
    node = jnp.arange(N_NODES)
    graph_id = node // P                                   # `batch` labels
    nxt = graph_id * P + (node % P + 1) % P
    src = jnp.concatenate([node, nxt])
    dst = jnp.concatenate([nxt, node])
    edge_index = jnp.stack([src, dst])                     # [2, E] (kept for shape report)

    # dense adjacency: adj[dst, src] = 1, plus self loops (GATConv default)
    adj = jnp.zeros((N_NODES, N_NODES), jnp.float32)
    adj = adj.at[dst, src].set(1.0)
    adj = adj.at[node, node].set(1.0)

    # dense one-hot graph membership mask
    seg = (jnp.arange(N_GRAPHS)[:, None] == graph_id[None, :]).astype(jnp.float32)

    out = graph_inferencer_forward(params, x, adj, query, seg)
    out = jax.block_until_ready(out)

    ref = jax.block_until_ready(_reference_forward(params, x, adj, query, seg))

    assert out.shape == (N_GRAPHS, CLASSES), out.shape
    assert bool(jnp.all(jnp.isfinite(out)))
    np.testing.assert_allclose(np.asarray(out), np.asarray(ref), rtol=5e-2, atol=5e-2)

    print("KERNEL_OK")
</pallas_src>

<mosaic_0001>
module attributes {stable_mosaic.version = 11 : i64} {
  func.func @_graph_inferencer_kernel(%arg0: memref<64x128xf32, #tpu.memory_space<vmem>>, %arg1: memref<64x64xf32, #tpu.memory_space<vmem>>, %arg2: memref<128x128xf32, #tpu.memory_space<vmem>>, %arg3: memref<1x128xf32, #tpu.memory_space<vmem>>, %arg4: memref<1x128xf32, #tpu.memory_space<vmem>>, %arg5: memref<1x128xf32, #tpu.memory_space<vmem>>, %arg6: memref<8x128xf32, #tpu.memory_space<vmem>>, %arg7: memref<8x64xf32, #tpu.memory_space<vmem>>, %arg8: memref<128x128xf32, #tpu.memory_space<vmem>>, %arg9: memref<16x128xf32, #tpu.memory_space<vmem>>, %arg10: memref<1x16xf32, #tpu.memory_space<vmem>>, %arg11: memref<8x16xf32, #tpu.memory_space<vmem>>) attributes {dimension_semantics = [], scalar_prefetch = 0 : i64, scratch_operands = 0 : i64, tpu.core_type = #tpu.core_type<tc>} {
    %c0 = arith.constant 0 : index
    %c0_0 = arith.constant 0 : index
    %0 = vector.load %arg0[%c0, %c0_0] : memref<64x128xf32, #tpu.memory_space<vmem>>, vector<64x128xf32>
    %c0_1 = arith.constant 0 : index
    %c0_2 = arith.constant 0 : index
    %1 = vector.load %arg1[%c0_1, %c0_2] : memref<64x64xf32, #tpu.memory_space<vmem>>, vector<64x64xf32>
    %c0_3 = arith.constant 0 : index
    %c0_4 = arith.constant 0 : index
    %2 = vector.load %arg2[%c0_3, %c0_4] : memref<128x128xf32, #tpu.memory_space<vmem>>, vector<128x128xf32>
    %3 = arith.truncf %2 : vector<128x128xf32> to vector<128x128xbf16>
    %c0_5 = arith.constant 0 : index
    %c0_6 = arith.constant 0 : index
    %4 = vector.load %arg3[%c0_5, %c0_6] : memref<1x128xf32, #tpu.memory_space<vmem>>, vector<1x128xf32>
    %c0_7 = arith.constant 0 : index
    %c0_8 = arith.constant 0 : index
    %5 = vector.load %arg4[%c0_7, %c0_8] : memref<1x128xf32, #tpu.memory_space<vmem>>, vector<1x128xf32>
    %c0_9 = arith.constant 0 : index
    %c0_10 = arith.constant 0 : index
    %6 = vector.load %arg5[%c0_9, %c0_10] : memref<1x128xf32, #tpu.memory_space<vmem>>, vector<1x128xf32>
    %7 = arith.truncf %0 : vector<64x128xf32> to vector<64x128xbf16>
    %cst = arith.constant dense<0.000000e+00> : vector<64x128xf32>
    %8 = tpu.matmul %7, %3, %cst {dimension_numbers = #tpu.dot_dimension_numbers<[1], [1], [0], [0], [0, 0, 1, 0], [], []>} : vector<64x128xbf16>, vector<128x128xbf16>, vector<64x128xf32> -> vector<64x128xf32>
    %cst_11 = arith.constant dense<0.000000e+00> : vector<1x64xf32>
    %9 = tpu.matmul %4, %8, %cst_11 {dimension_numbers = #tpu.dot_dimension_numbers<[1], [1], [0], [0], [0, 0, 1, 0], [], []>} : vector<1x128xf32>, vector<64x128xf32>, vector<1x64xf32> -> vector<1x64xf32>
    %cst_12 = arith.constant dense<0.000000e+00> : vector<64x1xf32>
    %10 = tpu.matmul %8, %5, %cst_12 {dimension_numbers = #tpu.dot_dimension_numbers<[1], [1], [0], [0], [0, 0, 1, 0], [], []>} : vector<64x128xf32>, vector<1x128xf32>, vector<64x1xf32> -> vector<64x1xf32>
    %11 = vector.broadcast %10 : vector<64x1xf32> to vector<64x64xf32>
    %12 = vector.broadcast %9 : vector<1x64xf32> to vector<64x64xf32>
    %13 = arith.addf %11, %12 : vector<64x64xf32>
    %cst_13 = arith.constant 0.000000e+00 : f32
    %14 = vector.broadcast %cst_13 : f32 to vector<64x64xf32>
    %15 = arith.cmpf oge, %13, %14 : vector<64x64xf32>
    %cst_14 = arith.constant 2.000000e-01 : f32
    %16 = vector.broadcast %cst_14 : f32 to vector<64x64xf32>
    %17 = arith.mulf %16, %13 : vector<64x64xf32>
    %18 = arith.select %15, %13, %17 : vector<64x64xi1>, vector<64x64xf32>
    %19 = arith.addf %18, %1 : vector<64x64xf32>
    %cst_15 = arith.constant dense<0xFF800000> : vector<64xf32>
    %20 = vector.multi_reduction <maximumf>, %19, %cst_15 [1] : vector<64x64xf32> to vector<64xf32>
    %21 = vector.shape_cast %20 : vector<64xf32> to vector<64x1xf32>
    %22 = vector.broadcast %21 : vector<64x1xf32> to vector<64x64xf32>
    %23 = arith.subf %19, %22 : vector<64x64xf32>
    %24 = math.exp %23 : vector<64x64xf32>
    %cst_16 = arith.constant dense<0.000000e+00> : vector<64xf32>
    %25 = vector.multi_reduction <add>, %24, %cst_16 [1] : vector<64x64xf32> to vector<64xf32>
    %26 = vector.shape_cast %25 : vector<64xf32> to vector<64x1xf32>
    %27 = tpu.reciprocal %26 {approx = true} : vector<64x1xf32> -> vector<64x1xf32>
    %28 = vector.broadcast %27 : vector<64x1xf32> to vector<64x64xf32>
    %29 = arith.mulf %24, %28 : vector<64x64xf32>
    %30 = arith.truncf %29 : vector<64x64xf32> to vector<64x64xbf16>
    %31 = arith.truncf %8 : vector<64x128xf32> to vector<64x128xbf16>
    %cst_17 = arith.constant dense<0.000000e+00> : vector<64x128xf32>
    %32 = tpu.matmul %30, %31, %cst_17 {dimension_numbers = #tpu.dot_dimension_numbers<[1], [0], [0], [1], [0, 0, 1, 1], [], []>} : vector<64x64xbf16>, vector<64x128xbf16>, vector<64x128xf32> -> vector<64x128xf32>
    %33 = vector.broadcast %6 : vector<1x128xf32> to vector<64x128xf32>
    %34 = arith.addf %32, %33 : vector<64x128xf32>
    %cst_18 = arith.constant 0.000000e+00 : f32
    %35 = vector.broadcast %cst_18 : f32 to vector<64x128xf32>
    %36 = arith.maximumf %34, %35 : vector<64x128xf32>
    %37 = arith.truncf %36 : vector<64x128xf32> to vector<64x128xbf16>
    %cst_19 = arith.constant dense<0.000000e+00> : vector<64x128xf32>
    %38 = tpu.matmul %37, %3, %cst_19 {dimension_numbers = #tpu.dot_dimension_numbers<[1], [1], [0], [0], [0, 0, 1, 0], [], []>} : vector<64x128xbf16>, vector<128x128xbf16>, vector<64x128xf32> -> vector<64x128xf32>
    %cst_20 = arith.constant dense<0.000000e+00> : vector<1x64xf32>
    %39 = tpu.matmul %4, %38, %cst_20 {dimension_numbers = #tpu.dot_dimension_numbers<[1], [1], [0], [0], [0, 0, 1, 0], [], []>} : vector<1x128xf32>, vector<64x128xf32>, vector<1x64xf32> -> vector<1x64xf32>
    %cst_21 = arith.constant dense<0.000000e+00> : vector<64x1xf32>
    %40 = tpu.matmul %38, %5, %cst_21 {dimension_numbers = #tpu.dot_dimension_numbers<[1], [1], [0], [0], [0, 0, 1, 0], [], []>} : vector<64x128xf32>, vector<1x128xf32>, vector<64x1xf32> -> vector<64x1xf32>
    %41 = vector.broadcast %40 : vector<64x1xf32> to vector<64x64xf32>
    %42 = vector.broadcast %39 : vector<1x64xf32> to vector<64x64xf32>
    %43 = arith.addf %41, %42 : vector<64x64xf32>
    %cst_22 = arith.constant 0.000000e+00 : f32
    %44 = vector.broadcast %cst_22 : f32 to vector<64x64xf32>
    %45 = arith.cmpf oge, %43, %44 : vector<64x64xf32>
    %cst_23 = arith.constant 2.000000e-01 : f32
    %46 = vector.broadcast %cst_23 : f32 to vector<64x64xf32>
    %47 = arith.mulf %46, %43 : vector<64x64xf32>
    %48 = arith.select %45, %43, %47 : vector<64x64xi1>, vector<64x64xf32>
    %49 = arith.addf %48, %1 : vector<64x64xf32>
    %cst_24 = arith.constant dense<0xFF800000> : vector<64xf32>
    %50 = vector.multi_reduction <maximumf>, %49, %cst_24 [1] : vector<64x64xf32> to vector<64xf32>
    %51 = vector.shape_cast %50 : vector<64xf32> to vector<64x1xf32>
    %52 = vector.broadcast %51 : vector<64x1xf32> to vector<64x64xf32>
    %53 = arith.subf %49, %52 : vector<64x64xf32>
    %54 = math.exp %53 : vector<64x64xf32>
    %cst_25 = arith.constant dense<0.000000e+00> : vector<64xf32>
    %55 = vector.multi_reduction <add>, %54, %cst_25 [1] : vector<64x64xf32> to vector<64xf32>
    %56 = vector.shape_cast %55 : vector<64xf32> to vector<64x1xf32>
    %57 = tpu.reciprocal %56 {approx = true} : vector<64x1xf32> -> vector<64x1xf32>
    %58 = vector.broadcast %57 : vector<64x1xf32> to vector<64x64xf32>
    %59 = arith.mulf %54, %58 : vector<64x64xf32>
    %60 = arith.truncf %59 : vector<64x64xf32> to vector<64x64xbf16>
    %61 = arith.truncf %38 : vector<64x128xf32> to vector<64x128xbf16>
    %cst_26 = arith.constant dense<0.000000e+00> : vector<64x128xf32>
    %62 = tpu.matmul %60, %61, %cst_26 {dimension_numbers = #tpu.dot_dimension_numbers<[1], [0], [0], [1], [0, 0, 1, 1], [], []>} : vector<64x64xbf16>, vector<64x128xbf16>, vector<64x128xf32> -> vector<64x128xf32>
    %63 = vector.broadcast %6 : vector<1x128xf32> to vector<64x128xf32>
    %64 = arith.addf %62, %63 : vector<64x128xf32>
    %cst_27 = arith.constant 0.000000e+00 : f32
    %65 = vector.broadcast %cst_27 : f32 to vector<64x128xf32>
    %66 = arith.maximumf %64, %65 : vector<64x128xf32>
    %67 = arith.truncf %66 : vector<64x128xf32> to vector<64x128xbf16>
    %cst_28 = arith.constant dense<0.000000e+00> : vector<64x128xf32>
    %68 = tpu.matmul %67, %3, %cst_28 {dimension_numbers = #tpu.dot_dimension_numbers<[1], [1], [0], [0], [0, 0, 1, 0], [], []>} : vector<64x128xbf16>, vector<128x128xbf16>, vector<64x128xf32> -> vector<64x128xf32>
    %cst_29 = arith.constant dense<0.000000e+00> : vector<1x64xf32>
    %69 = tpu.matmul %4, %68, %cst_29 {dimension_numbers = #tpu.dot_dimension_numbers<[1], [1], [0], [0], [0, 0, 1, 0], [], []>} : vector<1x128xf32>, vector<64x128xf32>, vector<1x64xf32> -> vector<1x64xf32>
    %cst_30 = arith.constant dense<0.000000e+00> : vector<64x1xf32>
    %70 = tpu.matmul %68, %5, %cst_30 {dimension_numbers = #tpu.dot_dimension_numbers<[1], [1], [0], [0], [0, 0, 1, 0], [], []>} : vector<64x128xf32>, vector<1x128xf32>, vector<64x1xf32> -> vector<64x1xf32>
    %71 = vector.broadcast %70 : vector<64x1xf32> to vector<64x64xf32>
    %72 = vector.broadcast %69 : vector<1x64xf32> to vector<64x64xf32>
    %73 = arith.addf %71, %72 : vector<64x64xf32>
    %cst_31 = arith.constant 0.000000e+00 : f32
    %74 = vector.broadcast %cst_31 : f32 to vector<64x64xf32>
    %75 = arith.cmpf oge, %73, %74 : vector<64x64xf32>
    %cst_32 = arith.constant 2.000000e-01 : f32
    %76 = vector.broadcast %cst_32 : f32 to vector<64x64xf32>
    %77 = arith.mulf %76, %73 : vector<64x64xf32>
    %78 = arith.select %75, %73, %77 : vector<64x64xi1>, vector<64x64xf32>
    %79 = arith.addf %78, %1 : vector<64x64xf32>
    %cst_33 = arith.constant dense<0xFF800000> : vector<64xf32>
    %80 = vector.multi_reduction <maximumf>, %79, %cst_33 [1] : vector<64x64xf32> to vector<64xf32>
    %81 = vector.shape_cast %80 : vector<64xf32> to vector<64x1xf32>
    %82 = vector.broadcast %81 : vector<64x1xf32> to vector<64x64xf32>
    %83 = arith.subf %79, %82 : vector<64x64xf32>
    %84 = math.exp %83 : vector<64x64xf32>
    %cst_34 = arith.constant dense<0.000000e+00> : vector<64xf32>
    %85 = vector.multi_reduction <add>, %84, %cst_34 [1] : vector<64x64xf32> to vector<64xf32>
    %86 = vector.shape_cast %85 : vector<64xf32> to vector<64x1xf32>
    %87 = tpu.reciprocal %86 {approx = true} : vector<64x1xf32> -> vector<64x1xf32>
    %88 = vector.broadcast %87 : vector<64x1xf32> to vector<64x64xf32>
    %89 = arith.mulf %84, %88 : vector<64x64xf32>
    %90 = arith.truncf %89 : vector<64x64xf32> to vector<64x64xbf16>
    %91 = arith.truncf %68 : vector<64x128xf32> to vector<64x128xbf16>
    %cst_35 = arith.constant dense<0.000000e+00> : vector<64x128xf32>
    %92 = tpu.matmul %90, %91, %cst_35 {dimension_numbers = #tpu.dot_dimension_numbers<[1], [0], [0], [1], [0, 0, 1, 1], [], []>} : vector<64x64xbf16>, vector<64x128xbf16>, vector<64x128xf32> -> vector<64x128xf32>
    %93 = vector.broadcast %6 : vector<1x128xf32> to vector<64x128xf32>
    %94 = arith.addf %92, %93 : vector<64x128xf32>
    %cst_36 = arith.constant 0.000000e+00 : f32
    %95 = vector.broadcast %cst_36 : f32 to vector<64x128xf32>
    %96 = arith.maximumf %94, %95 : vector<64x128xf32>
    %c0_37 = arith.constant 0 : index
    %c0_38 = arith.constant 0 : index
    %97 = vector.load %arg6[%c0_37, %c0_38] : memref<8x128xf32, #tpu.memory_space<vmem>>, vector<8x128xf32>
    %98 = arith.truncf %97 : vector<8x128xf32> to vector<8x128xbf16>
    %c0_39 = arith.constant 0 : index
    %c0_40 = arith.constant 0 : index
    %99 = vector.load %arg8[%c0_39, %c0_40] : memref<128x128xf32, #tpu.memory_space<vmem>>, vector<128x128xf32>
    %100 = arith.truncf %99 : vector<128x128xf32> to vector<128x128xbf16>
    %cst_41 = arith.constant dense<0.000000e+00> : vector<8x128xf32>
    %101 = tpu.matmul %98, %100, %cst_41 {dimension_numbers = #tpu.dot_dimension_numbers<[1], [0], [0], [1], [0, 0, 1, 1], [], []>} : vector<8x128xbf16>, vector<128x128xbf16>, vector<8x128xf32> -> vector<8x128xf32>
    %102 = arith.truncf %101 : vector<8x128xf32> to vector<8x128xbf16>
    %103 = arith.truncf %96 : vector<64x128xf32> to vector<64x128xbf16>
    %cst_42 = arith.constant dense<0.000000e+00> : vector<8x64xf32>
    %104 = tpu.matmul %102, %103, %cst_42 {dimension_numbers = #tpu.dot_dimension_numbers<[1], [1], [0], [0], [0, 0, 1, 0], [], []>} : vector<8x128xbf16>, vector<64x128xbf16>, vector<8x64xf32> -> vector<8x64xf32>
    %cst_43 = arith.constant 0.0883883461 : f32
    %105 = vector.broadcast %cst_43 : f32 to vector<8x64xf32>
    %106 = arith.mulf %104, %105 : vector<8x64xf32>
    %c0_44 = arith.constant 0 : index
    %c0_45 = arith.constant 0 : index
    %107 = vector.load %arg7[%c0_44, %c0_45] : memref<8x64xf32, #tpu.memory_space<vmem>>, vector<8x64xf32>
    %108 = arith.addf %106, %107 : vector<8x64xf32>
    %cst_46 = arith.constant dense<0xFF800000> : vector<8xf32>
    %109 = vector.multi_reduction <maximumf>, %108, %cst_46 [1] : vector<8x64xf32> to vector<8xf32>
    %110 = vector.shape_cast %109 : vector<8xf32> to vector<8x1xf32>
    %111 = vector.broadcast %110 : vector<8x1xf32> to vector<8x64xf32>
    %112 = arith.subf %108, %111 : vector<8x64xf32>
    %113 = math.exp %112 : vector<8x64xf32>
    %cst_47 = arith.constant dense<0.000000e+00> : vector<8xf32>
    %114 = vector.multi_reduction <add>, %113, %cst_47 [1] : vector<8x64xf32> to vector<8xf32>
    %115 = vector.shape_cast %114 : vector<8xf32> to vector<8x1xf32>
    %116 = tpu.reciprocal %115 {approx = true} : vector<8x1xf32> -> vector<8x1xf32>
    %117 = vector.broadcast %116 : vector<8x1xf32> to vector<8x64xf32>
    %118 = arith.mulf %113, %117 : vector<8x64xf32>
    %119 = arith.truncf %118 : vector<8x64xf32> to vector<8x64xbf16>
    %120 = arith.truncf %96 : vector<64x128xf32> to vector<64x128xbf16>
    %cst_48 = arith.constant dense<0.000000e+00> : vector<8x128xf32>
    %121 = tpu.matmul %119, %120, %cst_48 {dimension_numbers = #tpu.dot_dimension_numbers<[1], [0], [0], [1], [0, 0, 1, 1], [], []>} : vector<8x64xbf16>, vector<64x128xbf16>, vector<8x128xf32> -> vector<8x128xf32>
    %cst_49 = arith.constant 0.000000e+00 : f32
    %122 = vector.broadcast %cst_49 : f32 to vector<8x128xf32>
    %123 = arith.maximumf %121, %122 : vector<8x128xf32>
    %124 = arith.truncf %123 : vector<8x128xf32> to vector<8x128xbf16>
    %c0_50 = arith.constant 0 : index
    %c0_51 = arith.constant 0 : index
    %125 = vector.load %arg9[%c0_50, %c0_51] : memref<16x128xf32, #tpu.memory_space<vmem>>, vector<16x128xf32>
    %126 = arith.truncf %125 : vector<16x128xf32> to vector<16x128xbf16>
    %cst_52 = arith.constant dense<0.000000e+00> : vector<8x16xf32>
    %127 = tpu.matmul %124, %126, %cst_52 {dimension_numbers = #tpu.dot_dimension_numbers<[1], [1], [0], [0], [0, 0, 1, 0], [], []>} : vector<8x128xbf16>, vector<16x128xbf16>, vector<8x16xf32> -> vector<8x16xf32>
    %c0_53 = arith.constant 0 : index
    %c0_54 = arith.constant 0 : index
    %128 = vector.load %arg10[%c0_53, %c0_54] : memref<1x16xf32, #tpu.memory_space<vmem>>, vector<1x16xf32>
    %129 = vector.broadcast %128 : vector<1x16xf32> to vector<8x16xf32>
    %130 = arith.addf %127, %129 : vector<8x16xf32>
    %c0_55 = arith.constant 0 : index
    %c0_56 = arith.constant 0 : index
    %131 = vector.load %arg11[%c0_55, %c0_56] : memref<8x16xf32, #tpu.memory_space<vmem>>, vector<8x16xf32>
    tpu.vector_store %arg11[%c0_55, %c0_56], %130 {strides = array<i32>} : memref<8x16xf32, #tpu.memory_space<vmem>>, vector<8x16xf32>,
    return
  }
}

</mosaic_0001>

<bundles_post_ra>
// kernel: tpu_custom_call.1
= control target key start
LH: loop header
LB: loop body
LE: loop exit
PB: predicated region body
PF: predicated region fallthrough
CT: control target
= control target key end

     0   :  { %16 = vsyncpa [#allocation3], 0  ;;  %s2655_s0 = inlined_call_operand.hbm [shape: f32[64,128], index: 0, kind: input, shape index: {}]   ;;  %s2656_s1 = inlined_call_operand.hbm [shape: f32[64,64], index: 1, kind: input, shape index: {}]   ;;  %s2657_s2 = inlined_call_operand.hbm [shape: f32[128,128], index: 2, kind: input, shape index: {}]   ;;  %s2658_s3 = inlined_call_operand.vmem [shape: f32[1,128], index: 3, kind: input, shape index: {}]   ;;  %s2659_s4 = inlined_call_operand.vmem [shape: f32[1,128], index: 4, kind: input, shape index: {}]   ;;  %s2660_s5 = inlined_call_operand.vmem [shape: f32[1,128], index: 5, kind: input, shape index: {}]   ;;  %s2661_s6 = inlined_call_operand.vmem [shape: f32[8,128], index: 6, kind: input, shape index: {}]   ;;  %s2662_s7 = inlined_call_operand.hbm [shape: f32[8,64], index: 7, kind: input, shape index: {}]   ;;  %s2663_s8 = inlined_call_operand.hbm [shape: f32[128,128], index: 8, kind: input, shape index: {}]   ;;  %s2664_s9 = inlined_call_operand.vmem [shape: f32[16,128], index: 9, kind: input, shape index: {}]   ;;  %s2665_s10 = inlined_call_operand.vmem [shape: f32[1,16], index: 10, kind: input, shape index: {}]   ;;  %s2666_s11 = inlined_call_operand.hbm [shape: f32[8,16], index: 11, kind: output, shape index: {}]  }
   0x1   :  { %17 = vsyncpa [#allocation6], 0 }
   0x2   :  { %18 = vsyncpa [#allocation9], 0 }
   0x3   :  { %19 = vsyncpa [#allocation4], 0  ;;  %s2215_s17 = smov [#allocation5]   ;;  %s2216_s19 = smov [#allocation8]  }
   0x4   :  { %s37_s18 = sshll.u32 %s2215_s17, 4  ;;  %s70_s20 = sshll.u32 %s2216_s19, 4  ;;  %s38_s18 = int_to_ptr.vmem [resolvable:$true] %s37_s18  ;;  %s71_s20 = int_to_ptr.vmem [resolvable:$true] %s70_s20 }
   0x5   :  { %s2075_s23 = scalar_lea.hbm %s2656_s1, 1024 }
   0x6   :  { %p2076_p0 = scmp.ne.s32.totalorder %s2656_s1, %s2075_s23  ;;  %p2079_p1 = scmp.lt.u32.totalorder %s2075_s23, %s2656_s1 }
   0x8   :  { %p2081_p2 = pnand %p2079_p1, %p2076_p0 }
   0xa   :  { %2084 = shalt.err (!%p2081_p2)
}
   0xb   :  { %s2085_s28 = scalar_lea.vmem %s38_s18, 1024  ;;  %p2090_p4 = scmp.lt.s32.totalorder %s38_s18, %s38_s18 }
   0xc   :  { %p2086_p3 = scmp.ne.s32.totalorder %s38_s18, %s2085_s28  ;;  %p2091_p5 = scmp.lt.s32.totalorder %s2085_s28, %s2085_s28 }
   0xe   :  { %p2092_p6 = por %p2091_p5, %p2090_p4 }
  0x10   :  { %p2093_p7 = pnand %p2092_p6, %p2086_p3 }
  0x12   :  { %2096 = shalt.err (!%p2093_p7)
}
  0x13   :  { %s2217_s29 = smov 128   ;;  %s2218_s30 = smov 8  }
  0x14   :  { %43 = dma.hbm_to_vmem [thread:$0]  %s2656_s1, 1024, %s38_s18, [#allocation6], %s2217_s29, %s2217_s29, %s2218_s30  }
  0x15   :  { %s2097_s16 = scalar_lea.hbm %s2662_s7, 128 }
  0x16   :  { %p2098_p8 = scmp.ne.s32.totalorder %s2662_s7, %s2097_s16  ;;  %p2101_p9 = scmp.lt.u32.totalorder %s2097_s16, %s2662_s7 }
  0x18   :  { %p2103_p10 = pnand %p2101_p9, %p2098_p8 }
  0x1a   :  { %2106 = shalt.err (!%p2103_p10)
}
  0x1b   :  { %s2107_s23 = scalar_lea.vmem %s71_s20, 128  ;;  %p2112_p12 = scmp.lt.s32.totalorder %s71_s20, %s71_s20 }
  0x1c   :  { %p2108_p11 = scmp.ne.s32.totalorder %s71_s20, %s2107_s23  ;;  %p2113_p13 = scmp.lt.s32.totalorder %s2107_s23, %s2107_s23 }
  0x1e   :  { %p2114_p0 = por %p2113_p13, %p2112_p12 }
  0x20   :  { %p2115_p1 = pnand %p2114_p0, %p2108_p11 }
  0x22   :  { %2118 = shalt.err (!%p2115_p1)
}
  0x23   :  { %73 = dma.hbm_to_vmem [thread:$0]  %s2662_s7, 128, %s71_s20, [#allocation9]  }
  0x24   :  { %s2219_s24 = smov [#allocation2]   ;;  %s2220_s26 = smov [#allocation7]  }
  0x25   :  { %s25_s25 = sshll.u32 %s2219_s24, 4  ;;  %s49_s27 = sshll.u32 %s2220_s26, 4  ;;  %s26_s25 = int_to_ptr.vmem [resolvable:$true] %s25_s25  ;;  %s2313_s27 = int_to_ptr.vmem [resolvable:$true] %s49_s27 }
  0x26   :  { %s2119_s13 = scalar_lea.hbm %s2655_s0, 1024 }
  0x27   :  { %p2120_p2 = scmp.ne.s32.totalorder %s2655_s0, %s2119_s13  ;;  %p2123_p3 = scmp.lt.u32.totalorder %s2119_s13, %s2655_s0 }
  0x29   :  { %p2125_p4 = pnand %p2123_p3, %p2120_p2 }
  0x2b   :  { %2128 = shalt.err (!%p2125_p4)
}
  0x2c   :  { %s2129_s7 = scalar_lea.vmem %s26_s25, 1024  ;;  %p2134_p6 = scmp.lt.s32.totalorder %s26_s25, %s26_s25 }
  0x2d   :  { %p2130_p5 = scmp.ne.s32.totalorder %s26_s25, %s2129_s7  ;;  %p2135_p7 = scmp.lt.s32.totalorder %s2129_s7, %s2129_s7 }
  0x2f   :  { %p2136_p8 = por %p2135_p7, %p2134_p6 }
  0x31   :  { %p2137_p9 = pnand %p2136_p8, %p2130_p5 }
  0x33   :  { %2140 = shalt.err (!%p2137_p9)
}
  0x34   :  { %31 = dma.hbm_to_vmem [thread:$0]  %s2655_s0, 1024, %s26_s25, [#allocation3], %s2217_s29, %s2217_s29, %s2218_s30  }
  0x35   :  { %s2141_s23 = scalar_lea.hbm %s2657_s2, 2048 }
  0x36   :  { %p2142_p10 = scmp.ne.s32.totalorder %s2657_s2, %s2141_s23  ;;  %p2145_p11 = scmp.lt.u32.totalorder %s2141_s23, %s2657_s2 }
  0x38   :  { %p2147_p12 = pnand %p2145_p11, %p2142_p10 }
  0x3a   :  { %2150 = shalt.err (!%p2147_p12)
}
  0x3b   :  { %s2151_s28 = scalar_lea.vmem %s2313_s27, 2048  ;;  %p2156_p0 = scmp.lt.s32.totalorder %s2313_s27, %s2313_s27 }
  0x3c   :  { %p2152_p13 = scmp.ne.s32.totalorder %s2313_s27, %s2151_s28  ;;  %p2157_p1 = scmp.lt.s32.totalorder %s2151_s28, %s2151_s28 }
  0x3e   :  { %p2158_p2 = por %p2157_p1, %p2156_p0 }
  0x40   :  { %p2159_p3 = pnand %p2158_p2, %p2152_p13 }
  0x42   :  { %2162 = shalt.err (!%p2159_p3)
}
  0x43   :  { %55 = dma.hbm_to_vmem [thread:$0]  %s2657_s2, 2048, %s2313_s27, [#allocation6], %s2217_s29, %s2217_s29, %s2218_s30  }
  0x44   :  { %s2221_s12 = smov [#allocation10]   ;;  %s2163_s16 = scalar_lea.hbm %s2663_s8, 2048 }
  0x45   :  { %s79_s13 = sshll.u32 %s2221_s12, 4  ;;  %p2164_p4 = scmp.ne.s32.totalorder %s2663_s8, %s2163_s16  ;;  %s80_s13 = int_to_ptr.vmem [resolvable:$true] %s79_s13 }
  0x46   :  { %p2167_p5 = scmp.lt.u32.totalorder %s2163_s16, %s2663_s8 }
  0x48   :  { %p2169_p6 = pnand %p2167_p5, %p2164_p4 }
  0x4a   :  { %2172 = shalt.err (!%p2169_p6)
}
  0x4b   :  { %s2173_s21 = scalar_lea.vmem %s80_s13, 2048  ;;  %p2178_p8 = scmp.lt.s32.totalorder %s80_s13, %s80_s13 }
  0x4c   :  { %p2174_p7 = scmp.ne.s32.totalorder %s80_s13, %s2173_s21  ;;  %p2179_p9 = scmp.lt.s32.totalorder %s2173_s21, %s2173_s21 }
  0x4e   :  { %p2180_p10 = por %p2179_p9, %p2178_p8 }
  0x50   :  { %p2181_p11 = pnand %p2180_p10, %p2174_p7 }
  0x52   :  { %2184 = shalt.err (!%p2181_p11)
}
  0x53   :  { %85 = dma.hbm_to_vmem [thread:$0]  %s2663_s8, 2048, %s80_s13, [#allocation9], %s2217_s29, %s2217_s29, %s2218_s30  }
  0x54   :  { %2207 = dma.done.wait [#allocation3], 1024  }
  0x55   :  { %2208 = vsyncadd [#allocation3], 4294966272 }
  0x56   :  { %2209 = dma.done.wait [#allocation6], 3072  }
  0x57   :  { %2210 = vsyncadd [#allocation6], 4294964224 }
  0x58   :  { %2211 = dma.done.wait [#allocation9], 2176  }
  0x59   :  { %2212 = vsyncadd [#allocation9], 4294965120  ;;  %v122_v0 = vld [vmem:[#allocation7] sm:$0xff]  ;;  %v123_v1 = vld [vmem:[#allocation7 + $0x8] sm:$0xff]  ;;  %v2222_v36 = vmov 0.0|0.0   ;;  %vm2223_vm0 = vmmov 0   ;;  %v318_v62 = vlaneseq }
  0x5a   :  { %v124_v2 = vld [vmem:[#allocation7 + $0x10] sm:$0xff]  ;;  %v2365_v3 = vpack.c.bf16 %v123_v1, %v122_v0  ;;  %v125_v4 = vld [vmem:[#allocation7 + $0x18] sm:$0xff]  ;;  %v106_v6 = vld [vmem:[#allocation2] sm:$0xff]  ;;  %1917 = vmatprep.subr.bf16.mxu1 %v2222_v36  ;;  %v2224_v37 = vmov 0.0   ;;  %vm362_vm1 = vcmask 523264  }
  0x5b   :  { %v2367_v5 = vpack.c.bf16 %v125_v4, %v124_v2  ;;  %v107_v7 = vld [vmem:[#allocation2 + $0x8] sm:$0xff]  ;;  %v126_v8 = vld [vmem:[#allocation7 + $0x20] sm:$0xff]  ;;  %v128_v12 = vld [vmem:[#allocation7 + $0x30] sm:$0xff]  ;;  %1730 = vmatprep.mubr.msk.f32.mxu1 %vm2223_vm0, %v2224_v37  ;;  %v319_v1 = vshrl.u32 %v318_v62, 7 }
  0x5c   :  { %1690 = vmatprep.subr.bf16.mxu0 %v2365_v3  ;;  %v127_v9 = vld [vmem:[#allocation7 + $0x28] sm:$0xff]  ;;  %v149_v10 = vpack.c.bf16 %v107_v7, %v106_v6  ;;  %v129_v13 = vld [vmem:[#allocation7 + $0x38] sm:$0xff]  ;;  %v130_v15 = vld [vmem:[#allocation7 + $0x40] sm:$0xff] }
  0x5d   :  { %1691 = vmatpush3.bf16.xpose.msra.mxu0 %v2365_v3  ;;  %v2372_v11 = vpack.c.bf16 %v127_v9, %v126_v8  ;;  %v2376_v14 = vpack.c.bf16 %v129_v13, %v128_v12  ;;  %v131_v16 = vld [vmem:[#allocation7 + $0x48] sm:$0xff]  ;;  %v132_v18 = vld [vmem:[#allocation7 + $0x50] sm:$0xff]  ;;  %v133_v19 = vld [vmem:[#allocation7 + $0x58] sm:$0xff]  ;;  %v2426_v6 = vsub.s32 0, %v319_v1 }
  0x5e   :  { %1692 = vmatprep.subr.bf16.mxu0 %v2367_v5  ;;  %1706 = vmatprep.mubr.bf16.mxu0 %v149_v10  ;;  %v2380_v17 = vpack.c.bf16 %v131_v16, %v130_v15  ;;  %v2384_v20 = vpack.c.bf16 %v133_v19, %v132_v18  ;;  %v134_v21 = vld [vmem:[#allocation7 + $0x60] sm:$0xff]  ;;  %v135_v22 = vld [vmem:[#allocation7 + $0x68] sm:$0xff]  ;;  %v136_v24 = vld [vmem:[#allocation7 + $0x70] sm:$0xff] }
  0x5f   :  { %v2388_v23 = vpack.c.bf16 %v135_v22, %v134_v21  ;;  %v137_v25 = vld [vmem:[#allocation7 + $0x78] sm:$0xff]  ;;  %v108_v27 = vld [vmem:[#allocation2 + $0x10] sm:$0xff]  ;;  %v110_v29 = vld [vmem:[#allocation2 + $0x20] sm:$0xff] }
  0x60   :  { %v2392_v26 = vpack.c.bf16 %v137_v25, %v136_v24  ;;  %v109_v28 = vld [vmem:[#allocation2 + $0x18] sm:$0xff]  ;;  %v111_v30 = vld [vmem:[#allocation2 + $0x28] sm:$0xff]  ;;  %v112_v33 = vld [vmem:[#allocation2 + $0x30] sm:$0xff] }
  0x61   :  { %v150_v31 = vpack.c.bf16 %v109_v28, %v108_v27  ;;  %v151_v32 = vpack.c.bf16 %v111_v30, %v110_v29  ;;  %v113_v34 = vld [vmem:[#allocation2 + $0x38] sm:$0xff]  ;;  %v2406_v38 = vld [vmem:[%s2659_s4] ss:$0 sm:$0xff]  ;;  %v2429_v19 = vld [vmem:[#allocation5 + $0x8] sm:$0xff] }
  0x62   :  { %v152_v35 = vpack.c.bf16 %v113_v34, %v112_v33  ;;  %v2422_v59 = vld [vmem:[%s2658_s3] sm:$0x1]  ;;  %v2433_v22 = vld [vmem:[#allocation5 + $0x18] sm:$0xff]  ;;  %v2453_v62 = vld [vmem:[#allocation5 + $0x30] sm:$0xff] }
  0x63   :  { %v2431_v21 = vld [vmem:[#allocation5] sm:$0xff] }
  0x65   :  { %1693 = vmatpush3.bf16.xpose.msra.mxu0 %v2367_v5 }
  0x66   :  { %1694 = vmatprep.subr.bf16.mxu0 %v2372_v11 }
  0x6d   :  { %1695 = vmatpush3.bf16.xpose.msra.mxu0 %v2372_v11 }
  0x6e   :  { %1696 = vmatprep.subr.bf16.mxu0 %v2376_v14 }
  0x75   :  { %1697 = vmatpush3.bf16.xpose.msra.mxu0 %v2376_v14 }
  0x76   :  { %1698 = vmatprep.subr.bf16.mxu0 %v2380_v17 }
  0x7d   :  { %1699 = vmatpush3.bf16.xpose.msra.mxu0 %v2380_v17 }
  0x7e   :  { %1700 = vmatprep.subr.bf16.mxu0 %v2384_v20 }
  0x85   :  { %1701 = vmatpush3.bf16.xpose.msra.mxu0 %v2384_v20 }
  0x86   :  { %1702 = vmatprep.subr.bf16.mxu0 %v2388_v23 }
  0x8d   :  { %1703 = vmatpush3.bf16.xpose.msra.mxu0 %v2388_v23 }
  0x8e   :  { %1704 = vmatprep.subr.bf16.mxu0 %v2392_v26 }
  0x95   :  { %1705 = vmatpush3.bf16.xpose.msra.mxu0 %v2392_v26 }
  0x96   :  { %1929 = vmatprep.subr.bf16.mxu0 %v2222_v36 }
  0x9c   :  { %1707 = vmatmul.mubr.bf16.vlgmr.msra.gmra.mrb[0].mxu0 %v150_v31 }
  0x9d   :  { %1710 = vmatprep.mubr.bf16.mxu0 %v151_v32 }
  0xa4   :  { %1711 = vmatmul.mubr.bf16.gmra.mrb[4].mxu0 %v152_v35  ;;  %v2435_v35 = vld [vmem:[#allocation5 + $0x10] sm:$0xff] }
  0xa5   :  { %1789 = vmatprep.mubr.msk.f32.mxu0 %vm2223_vm0, %v2224_v37 }
 0x16f   :  { %v1708_v39 = vpop.f32.mrb[0].mxu0 }
 0x170   :  { %v187_v40 = vpop.f32.mrb[1].mxu0  ;;  %v296_v41 = vmul.f32 %v1708_v39, %v2406_v38 }
 0x171   :  { %v1709_v42 = vpop.f32.mrb[2].mxu0  ;;  %v294_v43 = vmul.f32 %v2406_v38, %v187_v40 }
 0x172   :  { %v1921_v44 = vpack.c.bf16 %v1709_v42, %v1708_v39  ;;  %306 = vadd.xlane.f32.xlu1 %v296_v41  ;;  %v190_v45 = vpop.f32.mrb[3].mxu0  ;;  %v297_v47 = vmul.f32 %v1709_v42, %v2406_v38 }
 0x173   :  { %v1918_v46 = vpack.c.bf16 %v190_v45, %v187_v40  ;;  %302 = vadd.xlane.f32.xlu0 %v294_v43  ;;  %v295_v48 = vmul.f32 %v2406_v38, %v190_v45 }
 0x175   :  { %1919 = vmatpush3.bf16.xpose.msra.mxu1 %v1918_v46 }
 0x176   :  { %308 = vadd.xlane.f32.xlu1 %v297_v47  ;;  %1920 = vmatprep.subr.bf16.mxu1 %v2222_v36 }
 0x177   :  { %304 = vadd.xlane.f32.xlu0 %v295_v48  ;;  %v1712_v49 = vpop.f32.mrb[4].mxu0 }
 0x178   :  { %v203_v50 = vpop.f32.mrb[5].mxu0  ;;  %v300_v57 = vmul.f32 %v1712_v49, %v2406_v38 }
 0x179   :  { %v1713_v51 = vpop.f32.mrb[6].mxu0  ;;  %v298_v52 = vmul.f32 %v2406_v38, %v203_v50 }
 0x17a   :  { %v1927_v53 = vpack.c.bf16 %v1713_v51, %v1712_v49  ;;  %v206_v54 = vpop.f32.mrb[7].mxu0  ;;  %v301_v58 = vmul.f32 %v1713_v51, %v2406_v38  ;;  %v2443_v49 = vld [vmem:[#allocation5 + $0x28] sm:$0xff]  ;;  %v2445_v51 = vld [vmem:[#allocation5 + $0x20] sm:$0xff] }
 0x17b   :  { %v1924_v55 = vpack.c.bf16 %v206_v54, %v203_v50  ;;  %310 = vadd.xlane.f32.xlu0 %v298_v52  ;;  %v299_v56 = vmul.f32 %v2406_v38, %v206_v54 }
 0x17d   :  { %1922 = vmatpush3.bf16.xpose.msra.mxu1 %v1921_v44  ;;  %312 = vadd.xlane.f32.xlu1 %v299_v56 }
 0x17e   :  { %1923 = vmatprep.subr.bf16.mxu1 %v2222_v36 }
 0x17f   :  { %314 = vadd.xlane.f32.xlu0 %v300_v57 }
 0x181   :  { %316 = vadd.xlane.f32.xlu1 %v301_v58 }
 0x185   :  { %1925 = vmatpush3.bf16.xpose.msra.mxu1 %v1924_v55 }
 0x186   :  { %1926 = vmatprep.subr.bf16.mxu1 %v2222_v36 }
 0x18d   :  { %1928 = vmatpush3.bf16.xpose.msra.mxu1 %v1927_v53 }
 0x18e   :  { %1733 = vmatprep.subr.bf16.mxu1 %v1918_v46 }
 0x194   :  { %1731 = vmatmul.mubr.f32.vlgmr.msra.gmra.mrb[0].mxu1 %v2422_v59 }
 0x195   :  { %1734 = vmatpush3.bf16.msra.mxu1 %v1918_v46 }
 0x196   :  { %1735 = vmatprep.subr.bf16.mxu1 %v1921_v44 }
 0x199   :  { %1736 = vmatpush3.bf16.msra.mxu1 %v1921_v44 }
 0x19a   :  { %1737 = vmatprep.subr.bf16.mxu1 %v1924_v55 }
 0x19d   :  { %1738 = vmatpush3.bf16.msra.mxu1 %v1924_v55 }
 0x19e   :  { %1739 = vmatprep.subr.bf16.mxu1 %v1927_v53 }
 0x1a1   :  { %1740 = vmatpush3.bf16.msra.mxu1 %v1927_v53 }
 0x1a2   :  { %1749 = vmatprep.subr.bf16.mxu1 %v2365_v3 }
 0x1ff   :  { %v307_v60 = vpop.xlane.xlu1 %306 }
 0x200   :  { %v303_v61 = vpop.xlane.xlu0 %302 }
 0x203   :  { %v309_v63 = vpop.xlane.xlu1 %308 }
 0x204   :  { %v305_v0 = vpop.xlane.xlu0 %304 }
 0x208   :  { %v311_v2 = vpop.xlane.xlu0 %310 }
 0x20a   :  { %v313_v4 = vpop.xlane.xlu1 %312 }
 0x20c   :  { %v315_v10 = vpop.xlane.xlu0 %314 }
 0x20e   :  { %v317_v12 = vpop.xlane.xlu1 %316 }
 0x267   :  { %v284_v7 = vpop.f32.mrb[0].mxu1 }
 0x268   :  { %v321_v8 = vrot.slane %v284_v7, %v2426_v6  ;;  %v1732_v9 = vpop.f32.mrb[1].mxu1 }
 0x26a   :  { %v323_v13 = vadd.f32 %v321_v8, %v305_v0  ;;  %v322_v15 = vadd.f32 %v321_v8, %v303_v61  ;;  %v325_v16 = vadd.f32 %v321_v8, %v309_v63  ;;  %v324_v18 = vadd.f32 %v321_v8, %v307_v60  ;;  %v2451_v60 = vld [vmem:[#allocation5 + $0x38] sm:$0xff] }
 0x26b   :  { %v327_v24 = vadd.f32 %v321_v8, %v313_v4  ;;  %v326_v25 = vadd.f32 %v321_v8, %v311_v2  ;;  %v329_v27 = vadd.f32 %v321_v8, %v317_v12  ;;  %v328_v28 = vadd.f32 %v321_v8, %v315_v10 }
 0x26c   :  { %vm331_vm2 = vcmp.ge.f32.partialorder %v323_v13, 0.0  ;;  %v339_v29 = vmul.f32 0.2, %v323_v13  ;;  %vm330_vm3 = vcmp.ge.f32.partialorder %v322_v15, 0.0  ;;  %v338_v30 = vmul.f32 0.2, %v322_v15 }
 0x26d   :  { %vm333_vm4 = vcmp.ge.f32.partialorder %v325_v16, 0.0  ;;  %v341_v31 = vmul.f32 0.2, %v325_v16  ;;  %vm332_vm5 = vcmp.ge.f32.partialorder %v324_v18, 0.0  ;;  %v340_v32 = vmul.f32 0.2, %v324_v18 }
 0x26e   :  { %v347_v33 = vsel %vm331_vm2, %v323_v13, %v339_v29  ;;  %v346_v34 = vsel %vm330_vm3, %v322_v15, %v338_v30  ;;  %vm335_vm6 = vcmp.ge.f32.partialorder %v327_v24, 0.0  ;;  %v343_v39 = vmul.f32 0.2, %v327_v24 }
 0x26f   :  { %v355_v40 = vadd.f32 %v347_v33, %v2429_v19  ;;  %v354_v41 = vadd.f32 %v346_v34, %v2431_v21  ;;  %v349_v42 = vsel %vm333_vm4, %v325_v16, %v341_v31  ;;  %v348_v43 = vsel %vm332_vm5, %v324_v18, %v340_v32 }
 0x270   :  { %v357_v44 = vadd.f32 %v349_v42, %v2433_v22  ;;  %vm334_vm7 = vcmp.ge.f32.partialorder %v326_v25, 0.0  ;;  %v356_v47 = vadd.f32 %v348_v43, %v2435_v35  ;;  %v342_v48 = vmul.f32 0.2, %v326_v25 }
 0x271   :  { %v366_v45 = vsel %vm362_vm1, %v355_v40, -inf  ;;  %v363_v46 = vsel %vm362_vm1, %v354_v41, -inf  ;;  %v351_v50 = vsel %vm335_vm6, %v327_v24, %v343_v39  ;;  %v345_v52 = vmul.f32 0.2, %v329_v27 }
 0x272   :  { %367 = vmax.xlane.f32.xlu1 %v366_v45  ;;  %364 = vmax.xlane.f32.xlu0 %v363_v46  ;;  %v350_v53 = vsel %vm334_vm7, %v326_v25, %v342_v48  ;;  %vm337_vm8 = vcmp.ge.f32.partialorder %v329_v27, 0.0  ;;  %vm336_vm9 = vcmp.ge.f32.partialorder %v328_v28, 0.0  ;;  %v344_v54 = vmul.f32 0.2, %v328_v28 }
 0x273   :  { %v372_v55 = vsel %vm362_vm1, %v357_v44, -inf  ;;  %v369_v56 = vsel %vm362_vm1, %v356_v47, -inf  ;;  %v359_v57 = vadd.f32 %v351_v50, %v2443_v49  ;;  %v358_v58 = vadd.f32 %v350_v53, %v2445_v51 }
 0x274   :  { %v353_v61 = vsel %vm337_vm8, %v329_v27, %v345_v52  ;;  %v352_v63 = vsel %vm336_vm9, %v328_v28, %v344_v54 }
 0x275   :  { %v378_v0 = vsel %vm362_vm1, %v359_v57, -inf  ;;  %v375_v1 = vsel %vm362_vm1, %v358_v58, -inf  ;;  %v361_v2 = vadd.f32 %v353_v61, %v2451_v60  ;;  %v360_v4 = vadd.f32 %v352_v63, %v2453_v62 }
 0x276   :  { %373 = vmax.xlane.f32.xlu1 %v372_v55  ;;  %370 = vmax.xlane.f32.xlu0 %v369_v56 }
 0x277   :  { %v384_v7 = vsel %vm362_vm1, %v361_v2, -inf  ;;  %v381_v8 = vsel %vm362_vm1, %v360_v4, -inf }
 0x27a   :  { %379 = vmax.xlane.f32.xlu1 %v378_v0  ;;  %376 = vmax.xlane.f32.xlu0 %v375_v1 }
 0x27e   :  { %385 = vmax.xlane.f32.xlu1 %v384_v7  ;;  %382 = vmax.xlane.f32.xlu0 %v381_v8 }
 0x2ff   :  { %v368_v9 = vpop.xlane.xlu1 %367  ;;  %v365_v10 = vpop.xlane.xlu0 %364 }
 0x300   :  { %v388_v12 = vsub.f32 %v355_v40, %v368_v9  ;;  %v387_v13 = vsub.f32 %v354_v41, %v365_v10 }
 0x302   :  { %v397_v15 = vmul.f32 1.442695, %v388_v12  ;;  %v395_v16 = vmul.f32 1.442695, %v387_v13 }
 0x303   :  { %v374_v18 = vpop.xlane.xlu1 %373  ;;  %v371_v24 = vpop.xlane.xlu0 %370 }
 0x304   :  { %1964 = vpow2.f32 %v397_v15  ;;  %v390_v25 = vsub.f32 %v357_v44, %v374_v18  ;;  %v389_v27 = vsub.f32 %v356_v47, %v371_v24 }
 0x305   :  { %1966 = vpow2.f32 %v395_v16 }
 0x306   :  { %v401_v28 = vmul.f32 1.442695, %v390_v25  ;;  %v399_v29 = vmul.f32 1.442695, %v389_v27 }
 0x307   :  { %v380_v30 = vpop.xlane.xlu1 %379  ;;  %v377_v31 = vpop.xlane.xlu0 %376 }
 0x308   :  { %1968 = vpow2.f32 %v401_v28  ;;  %v392_v32 = vsub.f32 %v359_v57, %v380_v30  ;;  %v391_v33 = vsub.f32 %v358_v58, %v377_v31 }
 0x309   :  { %1970 = vpow2.f32 %v399_v29 }
 0x30a   :  { %v405_v34 = vmul.f32 1.442695, %v392_v32  ;;  %v403_v39 = vmul.f32 1.442695, %v391_v33 }
 0x30b   :  { %v386_v40 = vpop.xlane.xlu1 %385  ;;  %v383_v41 = vpop.xlane.xlu0 %382 }
 0x30c   :  { %1972 = vpow2.f32 %v405_v34  ;;  %v394_v42 = vsub.f32 %v361_v2, %v386_v40  ;;  %v393_v43 = vsub.f32 %v360_v4, %v383_v41 }
 0x30d   :  { %1974 = vpow2.f32 %v403_v39 }
 0x30e   :  { %v1965_v45 = vpop.eup %1964  ;;  %v409_v44 = vmul.f32 1.442695, %v394_v42  ;;  %v407_v46 = vmul.f32 1.442695, %v393_v43 }
 0x30f   :  { %v1967_v47 = vpop.eup %1966  ;;  %v414_v48 = vsel %vm362_vm1, %v1965_v45, 0.0 }
 0x310   :  { %1976 = vpow2.f32 %v409_v44  ;;  %415 = vadd.xlane.f32.xlu1 %v414_v48  ;;  %v411_v50 = vsel %vm362_vm1, %v1967_v47, 0.0 }
 0x311   :  { %1978 = vpow2.f32 %v407_v46  ;;  %412 = vadd.xlane.f32.xlu0 %v411_v50 }
 0x312   :  { %v1969_v52 = vpop.eup %1968 }
 0x313   :  { %v1971_v53 = vpop.eup %1970  ;;  %v420_v54 = vsel %vm362_vm1, %v1969_v52, 0.0 }
 0x314   :  { %421 = vadd.xlane.f32.xlu1 %v420_v54  ;;  %v417_v55 = vsel %vm362_vm1, %v1971_v53, 0.0 }
 0x315   :  { %418 = vadd.xlane.f32.xlu0 %v417_v55 }
 0x316   :  { %v1973_v56 = vpop.eup %1972 }
 0x317   :  { %v1975_v57 = vpop.eup %1974  ;;  %v426_v58 = vsel %vm362_vm1, %v1973_v56, 0.0 }
 0x318   :  { %427 = vadd.xlane.f32.xlu1 %v426_v58  ;;  %v423_v61 = vsel %vm362_vm1, %v1975_v57, 0.0 }
 0x319   :  { %424 = vadd.xlane.f32.xlu0 %v423_v61 }
 0x31a   :  { %v1977_v63 = vpop.eup %1976 }
 0x31b   :  { %v1979_v0 = vpop.eup %1978  ;;  %v432_v1 = vsel %vm362_vm1, %v1977_v63, 0.0 }
 0x31c   :  { %433 = vadd.xlane.f32.xlu1 %v432_v1  ;;  %v429_v2 = vsel %vm362_vm1, %v1979_v0, 0.0 }
 0x31d   :  { %430 = vadd.xlane.f32.xlu0 %v429_v2 }
 0x39d   :  { %v416_v4 = vpop.xlane.xlu1 %415 }
 0x39e   :  { %1980 = vrcp.f32 %v416_v4  ;;  %v413_v7 = vpop.xlane.xlu0 %412 }
 0x39f   :  { %1982 = vrcp.f32 %v413_v7 }
 0x3a1   :  { %v422_v8 = vpop.xlane.xlu1 %421 }
 0x3a2   :  { %1984 = vrcp.f32 %v422_v8  ;;  %v419_v9 = vpop.xlane.xlu0 %418 }
 0x3a3   :  { %1986 = vrcp.f32 %v419_v9 }
 0x3a5   :  { %v428_v10 = vpop.xlane.xlu1 %427 }
 0x3a6   :  { %1988 = vrcp.f32 %v428_v10  ;;  %v425_v12 = vpop.xlane.xlu0 %424 }
 0x3a7   :  { %1990 = vrcp.f32 %v425_v12 }
 0x3a8   :  { %v1981_v13 = vpop.eup %1980 }
 0x3a9   :  { %v1983_v15 = vpop.eup %1982  ;;  %v434_v16 = vpop.xlane.xlu1 %433  ;;  %v444_v18 = vmul.f32 %v1981_v13, %v1965_v45 }
 0x3aa   :  { %1992 = vrcp.f32 %v434_v16  ;;  %v431_v24 = vpop.xlane.xlu0 %430  ;;  %v443_v25 = vmul.f32 %v1983_v15, %v1967_v47  ;;  %v2492_v47 = vld [vmem:[%s2660_s5] ss:$0 sm:$0xff] }
 0x3ab   :  { %1994 = vrcp.f32 %v431_v24 }
 0x3ac   :  { %v1985_v27 = vpop.eup %1984  ;;  %v451_v28 = vpack.c.bf16 %v444_v18, %v443_v25 }
 0x3ad   :  { %v1987_v29 = vpop.eup %1986  ;;  %v446_v30 = vmul.f32 %v1985_v27, %v1969_v52 }
 0x3ae   :  { %v445_v31 = vmul.f32 %v1987_v29, %v1971_v53  ;;  %1741 = vmatprep.mubr.msk.bf16.mxu1 %vm362_vm1, %v451_v28 }
 0x3b0   :  { %v1989_v32 = vpop.eup %1988  ;;  %v452_v33 = vpack.c.bf16 %v446_v30, %v445_v31 }
 0x3b1   :  { %v1991_v34 = vpop.eup %1990  ;;  %v448_v39 = vmul.f32 %v1989_v32, %v1973_v56 }
 0x3b2   :  { %1742 = vmatmul.mubr.msk.bf16.vlgmr.msra.gmra.mrb[4].mxu1 %vm362_vm1, %v452_v33  ;;  %v447_v40 = vmul.f32 %v1991_v34, %v1975_v57 }
 0x3b3   :  { %1750 = vmatpush3.bf16.xpose.msra.mxu1 %v2365_v3 }
 0x3b4   :  { %v1993_v41 = vpop.eup %1992  ;;  %v453_v42 = vpack.c.bf16 %v448_v39, %v447_v40  ;;  %1751 = vmatprep.subr.bf16.mxu1 %v2367_v5 }
 0x3b5   :  { %v1995_v43 = vpop.eup %1994  ;;  %v450_v45 = vmul.f32 %v1993_v41, %v1977_v63 }
 0x3b6   :  { %1745 = vmatprep.mubr.msk.bf16.mxu1 %vm362_vm1, %v453_v42  ;;  %v449_v44 = vmul.f32 %v1995_v43, %v1979_v0 }
 0x3b8   :  { %v454_v46 = vpack.c.bf16 %v450_v45, %v449_v44 }
 0x3ba   :  { %1746 = vmatmul.mubr.msk.bf16.gmra.mrb[8].mxu1 %vm362_vm1, %v454_v46 }
 0x3bb   :  { %1752 = vmatpush3.bf16.xpose.msra.mxu1 %v2367_v5 }
 0x3bc   :  { %1753 = vmatprep.subr.bf16.mxu1 %v2372_v11 }
 0x3c3   :  { %1754 = vmatpush3.bf16.xpose.msra.mxu1 %v2372_v11 }
 0x3c4   :  { %1755 = vmatprep.subr.bf16.mxu1 %v2376_v14 }
 0x3cb   :  { %1756 = vmatpush3.bf16.xpose.msra.mxu1 %v2376_v14 }
 0x3cc   :  { %1757 = vmatprep.subr.bf16.mxu1 %v2380_v17 }
 0x3d3   :  { %1758 = vmatpush3.bf16.xpose.msra.mxu1 %v2380_v17 }
 0x3d4   :  { %1759 = vmatprep.subr.bf16.mxu1 %v2384_v20 }
 0x3db   :  { %1760 = vmatpush3.bf16.xpose.msra.mxu1 %v2384_v20 }
 0x3dc   :  { %1761 = vmatprep.subr.bf16.mxu1 %v2388_v23 }
 0x3e3   :  { %1762 = vmatpush3.bf16.xpose.msra.mxu1 %v2388_v23 }
 0x3e4   :  { %1763 = vmatprep.subr.bf16.mxu1 %v2392_v26 }
 0x3eb   :  { %1764 = vmatpush3.bf16.xpose.msra.mxu1 %v2392_v26 }
 0x3ec   :  { %1941 = vmatprep.subr.bf16.mxu1 %v2222_v36 }
 0x485   :  { %v1743_v48 = vpop.f32.mrb[4].mxu1 }
 0x486   :  { %v520_v50 = vadd.f32 %v1743_v48, %v2492_v47  ;;  %v511_v52 = vpop.f32.mrb[5].mxu1 }
 0x487   :  { %v512_v53 = vadd.f32 %v2492_v47, %v511_v52  ;;  %v1744_v54 = vpop.f32.mrb[6].mxu1 }
 0x488   :  { %v523_v55 = vadd.f32 %v1744_v54, %v2492_v47  ;;  %v514_v56 = vpop.f32.mrb[7].mxu1  ;;  %v544_v58 = vmax.f32 %v520_v50, 0.0 }
 0x489   :  { %v515_v57 = vadd.f32 %v2492_v47, %v514_v56  ;;  %v542_v63 = vmax.f32 %v512_v53, 0.0 }
 0x48a   :  { %v545_v61 = vmax.f32 %v523_v55, 0.0 }
 0x48b   :  { %v543_v0 = vmax.f32 %v515_v57, 0.0 }
 0x48c   :  { %v551_v1 = vpack.c.bf16 %v545_v61, %v544_v58 }
 0x48d   :  { %v550_v2 = vpack.c.bf16 %v543_v0, %v542_v63  ;;  %v1747_v4 = vpop.f32.mrb[8].mxu1 }
 0x48e   :  { %v536_v7 = vadd.f32 %v1747_v4, %v2492_v47  ;;  %v527_v8 = vpop.f32.mrb[9].mxu1 }
 0x48f   :  { %v528_v9 = vadd.f32 %v2492_v47, %v527_v8  ;;  %v1748_v10 = vpop.f32.mrb[10].mxu1  ;;  %1765 = vmatprep.mubr.bf16.mxu1 %v550_v2 }
 0x490   :  { %v539_v12 = vadd.f32 %v1748_v10, %v2492_v47  ;;  %v530_v13 = vpop.f32.mrb[11].mxu1  ;;  %1766 = vmatmul.mubr.bf16.vlgmr.msra.gmra.mrb[12].mxu1 %v551_v1  ;;  %v548_v16 = vmax.f32 %v536_v7, 0.0 }
 0x491   :  { %v531_v15 = vadd.f32 %v2492_v47, %v530_v13  ;;  %v546_v24 = vmax.f32 %v528_v9, 0.0 }
 0x492   :  { %v549_v18 = vmax.f32 %v539_v12, 0.0 }
 0x493   :  { %v547_v25 = vmax.f32 %v531_v15, 0.0 }
 0x494   :  { %v553_v27 = vpack.c.bf16 %v549_v18, %v548_v16 }
 0x495   :  { %v552_v28 = vpack.c.bf16 %v547_v25, %v546_v24 }
 0x497   :  { %1769 = vmatprep.mubr.bf16.mxu1 %v552_v28 }
 0x498   :  { %1770 = vmatmul.mubr.bf16.gmra.mrb[16].mxu1 %v553_v27 }
 0x499   :  { %1848 = vmatprep.mubr.msk.f32.mxu1 %vm2223_vm0, %v2224_v37 }
 0x563   :  { %v1767_v29 = vpop.f32.mrb[12].mxu1 }
 0x564   :  { %v588_v30 = vpop.f32.mrb[13].mxu1  ;;  %v691_v41 = vmul.f32 %v1767_v29, %v2406_v38 }
 0x565   :  { %v1768_v31 = vpop.f32.mrb[14].mxu1  ;;  %v689_v32 = vmul.f32 %v2406_v38, %v588_v30 }
 0x566   :  { %v1933_v33 = vpack.c.bf16 %v1768_v31, %v1767_v29  ;;  %v591_v34 = vpop.f32.mrb[15].mxu1  ;;  %v692_v43 = vmul.f32 %v1768_v31, %v2406_v38 }
 0x567   :  { %v1930_v39 = vpack.c.bf16 %v591_v34, %v588_v30  ;;  %697 = vadd.xlane.f32.xlu0 %v689_v32  ;;  %v690_v40 = vmul.f32 %v2406_v38, %v591_v34 }
 0x569   :  { %699 = vadd.xlane.f32.xlu1 %v690_v40  ;;  %1931 = vmatpush3.bf16.xpose.msra.mxu0 %v1930_v39 }
 0x56a   :  { %1932 = vmatprep.subr.bf16.mxu0 %v2222_v36 }
 0x56b   :  { %701 = vadd.xlane.f32.xlu0 %v691_v41  ;;  %v1771_v42 = vpop.f32.mrb[16].mxu1 }
 0x56c   :  { %v604_v45 = vpop.f32.mrb[17].mxu1  ;;  %v695_v54 = vmul.f32 %v1771_v42, %v2406_v38 }
 0x56d   :  { %703 = vadd.xlane.f32.xlu1 %v692_v43  ;;  %v1772_v44 = vpop.f32.mrb[18].mxu1  ;;  %v693_v46 = vmul.f32 %v2406_v38, %v604_v45 }
 0x56e   :  { %v1939_v48 = vpack.c.bf16 %v1772_v44, %v1771_v42  ;;  %v607_v50 = vpop.f32.mrb[19].mxu1  ;;  %v696_v55 = vmul.f32 %v1772_v44, %v2406_v38 }
 0x56f   :  { %v1936_v52 = vpack.c.bf16 %v607_v50, %v604_v45  ;;  %705 = vadd.xlane.f32.xlu0 %v693_v46  ;;  %v694_v53 = vmul.f32 %v2406_v38, %v607_v50 }
 0x571   :  { %1934 = vmatpush3.bf16.xpose.msra.mxu0 %v1933_v33  ;;  %707 = vadd.xlane.f32.xlu1 %v694_v53 }
 0x572   :  { %1935 = vmatprep.subr.bf16.mxu0 %v2222_v36 }
 0x573   :  { %709 = vadd.xlane.f32.xlu0 %v695_v54 }
 0x575   :  { %711 = vadd.xlane.f32.xlu1 %v696_v55 }
 0x579   :  { %1937 = vmatpush3.bf16.xpose.msra.mxu0 %v1936_v52 }
 0x57a   :  { %1938 = vmatprep.subr.bf16.mxu0 %v2222_v36 }
 0x581   :  { %1940 = vmatpush3.bf16.xpose.msra.mxu0 %v1939_v48 }
 0x582   :  { %1792 = vmatprep.subr.bf16.mxu0 %v1930_v39 }
 0x588   :  { %1790 = vmatmul.mubr.f32.vlgmr.msra.gmra.mrb[8].mxu0 %v2422_v59 }
 0x589   :  { %1793 = vmatpush3.bf16.msra.mxu0 %v1930_v39 }
 0x58a   :  { %1794 = vmatprep.subr.bf16.mxu0 %v1933_v33 }
 0x58d   :  { %1795 = vmatpush3.bf16.msra.mxu0 %v1933_v33 }
 0x58e   :  { %1796 = vmatprep.subr.bf16.mxu0 %v1936_v52 }
 0x591   :  { %1797 = vmatpush3.bf16.msra.mxu0 %v1936_v52 }
 0x592   :  { %1798 = vmatprep.subr.bf16.mxu0 %v1939_v48 }
 0x595   :  { %1799 = vmatpush3.bf16.msra.mxu0 %v1939_v48 }
 0x596   :  { %1808 = vmatprep.subr.bf16.mxu0 %v2365_v3 }
 0x5f4   :  { %v698_v56 = vpop.xlane.xlu0 %697 }
 0x5f6   :  { %v700_v57 = vpop.xlane.xlu1 %699 }
 0x5f8   :  { %v702_v38 = vpop.xlane.xlu0 %701 }
 0x5fa   :  { %v704_v58 = vpop.xlane.xlu1 %703 }
 0x5fc   :  { %v706_v61 = vpop.xlane.xlu0 %705 }
 0x5fe   :  { %v708_v63 = vpop.xlane.xlu1 %707 }
 0x600   :  { %v710_v59 = vpop.xlane.xlu0 %709 }
 0x602   :  { %v712_v4 = vpop.xlane.xlu1 %711 }
 0x65b   :  { %v685_v0 = vpop.f32.mrb[8].mxu0 }
 0x65c   :  { %v716_v1 = vrot.slane %v685_v0, %v2426_v6  ;;  %v1791_v2 = vpop.f32.mrb[9].mxu0 }
 0x65e   :  { %v718_v7 = vadd.f32 %v716_v1, %v700_v57  ;;  %v717_v8 = vadd.f32 %v716_v1, %v698_v56  ;;  %v720_v9 = vadd.f32 %v716_v1, %v704_v58  ;;  %v719_v10 = vadd.f32 %v716_v1, %v702_v38 }
 0x65f   :  { %v722_v12 = vadd.f32 %v716_v1, %v708_v63  ;;  %v721_v13 = vadd.f32 %v716_v1, %v706_v61  ;;  %v724_v15 = vadd.f32 %v716_v1, %v712_v4  ;;  %v723_v16 = vadd.f32 %v716_v1, %v710_v59 }
 0x660   :  { %vm726_vm10 = vcmp.ge.f32.partialorder %v718_v7, 0.0  ;;  %v734_v18 = vmul.f32 0.2, %v718_v7  ;;  %vm725_vm11 = vcmp.ge.f32.partialorder %v717_v8, 0.0  ;;  %v733_v24 = vmul.f32 0.2, %v717_v8 }
 0x661   :  { %vm728_vm12 = vcmp.ge.f32.partialorder %v720_v9, 0.0  ;;  %v736_v25 = vmul.f32 0.2, %v720_v9  ;;  %vm727_vm13 = vcmp.ge.f32.partialorder %v719_v10, 0.0  ;;  %v735_v27 = vmul.f32 0.2, %v719_v10 }
 0x662   :  { %v742_v28 = vsel %vm726_vm10, %v718_v7, %v734_v18  ;;  %v741_v29 = vsel %vm725_vm11, %v717_v8, %v733_v24  ;;  %vm730_vm14 = vcmp.ge.f32.partialorder %v722_v12, 0.0  ;;  %v738_v30 = vmul.f32 0.2, %v722_v12 }
 0x663   :  { %v750_v31 = vadd.f32 %v742_v28, %v2429_v19  ;;  %v749_v32 = vadd.f32 %v741_v29, %v2431_v21  ;;  %v744_v33 = vsel %vm728_vm12, %v720_v9, %v736_v25  ;;  %v743_v34 = vsel %vm727_vm13, %v719_v10, %v735_v27 }
 0x664   :  { %v752_v39 = vadd.f32 %v744_v33, %v2433_v22  ;;  %vm729_vm15 = vcmp.ge.f32.partialorder %v721_v13, 0.0  ;;  %v751_v42 = vadd.f32 %v743_v34, %v2435_v35  ;;  %v737_v43 = vmul.f32 0.2, %v721_v13 }
 0x665   :  { %v760_v40 = vsel %vm362_vm1, %v750_v31, -inf  ;;  %v757_v41 = vsel %vm362_vm1, %v749_v32, -inf  ;;  %v746_v45 = vsel %vm730_vm14, %v722_v12, %v738_v30  ;;  %v740_v44 = vmul.f32 0.2, %v724_v15 }
 0x666   :  { %761 = vmax.xlane.f32.xlu1 %v760_v40  ;;  %758 = vmax.xlane.f32.xlu0 %v757_v41  ;;  %v745_v46 = vsel %vm729_vm15, %v721_v13, %v737_v43  ;;  %vm732_vm2 = vcmp.ge.f32.partialorder %v724_v15, 0.0  ;;  %vm731_vm3 = vcmp.ge.f32.partialorder %v723_v16, 0.0  ;;  %v739_v19 = vmul.f32 0.2, %v723_v16 }
 0x667   :  { %v766_v21 = vsel %vm362_vm1, %v752_v39, -inf  ;;  %v763_v22 = vsel %vm362_vm1, %v751_v42, -inf  ;;  %v754_v48 = vadd.f32 %v746_v45, %v2443_v49  ;;  %v753_v50 = vadd.f32 %v745_v46, %v2445_v51 }
 0x668   :  { %v748_v35 = vsel %vm732_vm2, %v724_v15, %v740_v44  ;;  %v747_v52 = vsel %vm731_vm3, %v723_v16, %v739_v19 }
 0x669   :  { %v772_v53 = vsel %vm362_vm1, %v754_v48, -inf  ;;  %v769_v54 = vsel %vm362_vm1, %v753_v50, -inf  ;;  %v756_v55 = vadd.f32 %v748_v35, %v2451_v60  ;;  %v755_v56 = vadd.f32 %v747_v52, %v2453_v62 }
 0x66a   :  { %767 = vmax.xlane.f32.xlu1 %v766_v21  ;;  %764 = vmax.xlane.f32.xlu0 %v763_v22 }
 0x66b   :  { %v778_v57 = vsel %vm362_vm1, %v756_v55, -inf  ;;  %v775_v49 = vsel %vm362_vm1, %v755_v56, -inf }
 0x66e   :  { %773 = vmax.xlane.f32.xlu1 %v772_v53  ;;  %770 = vmax.xlane.f32.xlu0 %v769_v54 }
 0x672   :  { %779 = vmax.xlane.f32.xlu1 %v778_v57  ;;  %776 = vmax.xlane.f32.xlu0 %v775_v49 }
 0x6f3   :  { %v762_v51 = vpop.xlane.xlu1 %761  ;;  %v759_v38 = vpop.xlane.xlu0 %758 }
 0x6f4   :  { %v782_v58 = vsub.f32 %v750_v31, %v762_v51  ;;  %v781_v61 = vsub.f32 %v749_v32, %v759_v38 }
 0x6f6   :  { %v791_v63 = vmul.f32 1.442695, %v782_v58  ;;  %v789_v0 = vmul.f32 1.442695, %v781_v61 }
 0x6f7   :  { %v768_v1 = vpop.xlane.xlu1 %767  ;;  %v765_v2 = vpop.xlane.xlu0 %764 }
 0x6f8   :  { %1996 = vpow2.f32 %v791_v63  ;;  %v784_v60 = vsub.f32 %v752_v39, %v768_v1  ;;  %v783_v59 = vsub.f32 %v751_v42, %v765_v2 }
 0x6f9   :  { %1998 = vpow2.f32 %v789_v0 }
 0x6fa   :  { %v795_v62 = vmul.f32 1.442695, %v784_v60  ;;  %v793_v4 = vmul.f32 1.442695, %v783_v59 }
 0x6fb   :  { %v774_v7 = vpop.xlane.xlu1 %773  ;;  %v771_v8 = vpop.xlane.xlu0 %770 }
 0x6fc   :  { %2000 = vpow2.f32 %v795_v62  ;;  %v786_v9 = vsub.f32 %v754_v48, %v774_v7  ;;  %v785_v10 = vsub.f32 %v753_v50, %v771_v8 }
 0x6fd   :  { %2002 = vpow2.f32 %v793_v4 }
 0x6fe   :  { %v799_v12 = vmul.f32 1.442695, %v786_v9  ;;  %v797_v13 = vmul.f32 1.442695, %v785_v10 }
 0x6ff   :  { %v780_v15 = vpop.xlane.xlu1 %779  ;;  %v777_v16 = vpop.xlane.xlu0 %776 }
 0x700   :  { %2004 = vpow2.f32 %v799_v12  ;;  %v788_v18 = vsub.f32 %v756_v55, %v780_v15  ;;  %v787_v24 = vsub.f32 %v755_v56, %v777_v16 }
 0x701   :  { %2006 = vpow2.f32 %v797_v13 }
 0x702   :  { %v1997_v25 = vpop.eup %1996  ;;  %v803_v27 = vmul.f32 1.442695, %v788_v18  ;;  %v801_v28 = vmul.f32 1.442695, %v787_v24 }
 0x703   :  { %v1999_v29 = vpop.eup %1998  ;;  %v808_v30 = vsel %vm362_vm1, %v1997_v25, 0.0 }
 0x704   :  { %2008 = vpow2.f32 %v803_v27  ;;  %809 = vadd.xlane.f32.xlu1 %v808_v30  ;;  %v805_v31 = vsel %vm362_vm1, %v1999_v29, 0.0 }
 0x705   :  { %2010 = vpow2.f32 %v801_v28  ;;  %806 = vadd.xlane.f32.xlu0 %v805_v31 }
 0x706   :  { %v2001_v32 = vpop.eup %2000 }
 0x707   :  { %v2003_v33 = vpop.eup %2002  ;;  %v814_v34 = vsel %vm362_vm1, %v2001_v32, 0.0 }
 0x708   :  { %815 = vadd.xlane.f32.xlu1 %v814_v34  ;;  %v811_v39 = vsel %vm362_vm1, %v2003_v33, 0.0 }
 0x709   :  { %812 = vadd.xlane.f32.xlu0 %v811_v39 }
 0x70a   :  { %v2005_v40 = vpop.eup %2004 }
 0x70b   :  { %v2007_v41 = vpop.eup %2006  ;;  %v820_v42 = vsel %vm362_vm1, %v2005_v40, 0.0 }
 0x70c   :  { %821 = vadd.xlane.f32.xlu1 %v820_v42  ;;  %v817_v43 = vsel %vm362_vm1, %v2007_v41, 0.0 }
 0x70d   :  { %818 = vadd.xlane.f32.xlu0 %v817_v43 }
 0x70e   :  { %v2009_v45 = vpop.eup %2008 }
 0x70f   :  { %v2011_v44 = vpop.eup %2010  ;;  %v826_v46 = vsel %vm362_vm1, %v2009_v45, 0.0 }
 0x710   :  { %827 = vadd.xlane.f32.xlu1 %v826_v46  ;;  %v823_v19 = vsel %vm362_vm1, %v2011_v44, 0.0 }
 0x711   :  { %824 = vadd.xlane.f32.xlu0 %v823_v19  ;;  %v2064_v19 = vld [vmem:[%s2659_s4] ss:$0 sm:$0xff] }
 0x791   :  { %v810_v21 = vpop.xlane.xlu1 %809 }
 0x792   :  { %2012 = vrcp.f32 %v810_v21  ;;  %v807_v22 = vpop.xlane.xlu0 %806 }
 0x793   :  { %2014 = vrcp.f32 %v807_v22 }
 0x795   :  { %v816_v48 = vpop.xlane.xlu1 %815 }
 0x796   :  { %2016 = vrcp.f32 %v816_v48  ;;  %v813_v50 = vpop.xlane.xlu0 %812 }
 0x797   :  { %2018 = vrcp.f32 %v813_v50 }
 0x799   :  { %v822_v35 = vpop.xlane.xlu1 %821 }
 0x79a   :  { %2020 = vrcp.f32 %v822_v35  ;;  %v819_v52 = vpop.xlane.xlu0 %818 }
 0x79b   :  { %2022 = vrcp.f32 %v819_v52 }
 0x79c   :  { %v2013_v53 = vpop.eup %2012 }
 0x79d   :  { %v2015_v54 = vpop.eup %2014  ;;  %v828_v55 = vpop.xlane.xlu1 %827  ;;  %v838_v56 = vmul.f32 %v2013_v53, %v1997_v25 }
 0x79e   :  { %2024 = vrcp.f32 %v828_v55  ;;  %v825_v57 = vpop.xlane.xlu0 %824  ;;  %v837_v49 = vmul.f32 %v2015_v54, %v1999_v29 }
 0x79f   :  { %2026 = vrcp.f32 %v825_v57 }
 0x7a0   :  { %v2017_v51 = vpop.eup %2016  ;;  %v845_v38 = vpack.c.bf16 %v838_v56, %v837_v49 }
 0x7a1   :  { %v2019_v58 = vpop.eup %2018  ;;  %v840_v61 = vmul.f32 %v2017_v51, %v2001_v32 }
 0x7a2   :  { %v839_v63 = vmul.f32 %v2019_v58, %v2003_v33  ;;  %1800 = vmatprep.mubr.msk.bf16.mxu0 %vm362_vm1, %v845_v38 }
 0x7a4   :  { %v2021_v0 = vpop.eup %2020  ;;  %v846_v1 = vpack.c.bf16 %v840_v61, %v839_v63  ;;  %v2065_v63 = vld [vmem:[%s2658_s3] sm:$0x1] }
 0x7a5   :  { %v2023_v2 = vpop.eup %2022  ;;  %v842_v60 = vmul.f32 %v2021_v0, %v2005_v40 }
 0x7a6   :  { %1801 = vmatmul.mubr.msk.bf16.vlgmr.msra.gmra.mrb[12].mxu0 %vm362_vm1, %v846_v1  ;;  %v841_v59 = vmul.f32 %v2023_v2, %v2007_v41 }
 0x7a7   :  { %1809 = vmatpush3.bf16.xpose.msra.mxu0 %v2365_v3 }
 0x7a8   :  { %v2025_v62 = vpop.eup %2024  ;;  %v847_v4 = vpack.c.bf16 %v842_v60, %v841_v59  ;;  %1810 = vmatprep.subr.bf16.mxu0 %v2367_v5 }
 0x7a9   :  { %v2027_v7 = vpop.eup %2026  ;;  %v844_v8 = vmul.f32 %v2025_v62, %v2009_v45 }
 0x7aa   :  { %1804 = vmatprep.mubr.msk.bf16.mxu0 %vm362_vm1, %v847_v4  ;;  %v843_v9 = vmul.f32 %v2027_v7, %v2011_v44 }
 0x7ac   :  { %v848_v10 = vpack.c.bf16 %v844_v8, %v843_v9 }
 0x7ae   :  { %1805 = vmatmul.mubr.msk.bf16.gmra.mrb[16].mxu0 %vm362_vm1, %v848_v10 }
 0x7af   :  { %1811 = vmatpush3.bf16.xpose.msra.mxu0 %v2367_v5 }
 0x7b0   :  { %1812 = vmatprep.subr.bf16.mxu0 %v2372_v11 }
 0x7b7   :  { %1813 = vmatpush3.bf16.xpose.msra.mxu0 %v2372_v11 }
 0x7b8   :  { %1814 = vmatprep.subr.bf16.mxu0 %v2376_v14 }
 0x7bf   :  { %1815 = vmatpush3.bf16.xpose.msra.mxu0 %v2376_v14 }
 0x7c0   :  { %1816 = vmatprep.subr.bf16.mxu0 %v2380_v17 }
 0x7c7   :  { %1817 = vmatpush3.bf16.xpose.msra.mxu0 %v2380_v17 }
 0x7c8   :  { %1818 = vmatprep.subr.bf16.mxu0 %v2384_v20 }
 0x7cf   :  { %1819 = vmatpush3.bf16.xpose.msra.mxu0 %v2384_v20 }
 0x7d0   :  { %1820 = vmatprep.subr.bf16.mxu0 %v2388_v23 }
 0x7d7   :  { %1821 = vmatpush3.bf16.xpose.msra.mxu0 %v2388_v23 }
 0x7d8   :  { %1822 = vmatprep.subr.bf16.mxu0 %v2392_v26 }
 0x7df   :  { %1823 = vmatpush3.bf16.xpose.msra.mxu0 %v2392_v26 }
 0x7e0   :  { %1887 = vmatprep.subr.bf16.mxu0 %v2224_v37 }
 0x879   :  { %v1802_v3 = vpop.f32.mrb[12].mxu0 }
 0x87a   :  { %v908_v5 = vadd.f32 %v1802_v3, %v2492_v47  ;;  %v899_v11 = vpop.f32.mrb[13].mxu0 }
 0x87b   :  { %v900_v14 = vadd.f32 %v2492_v47, %v899_v11  ;;  %v1803_v17 = vpop.f32.mrb[14].mxu0 }
 0x87c   :  { %v911_v12 = vadd.f32 %v1803_v17, %v2492_v47  ;;  %v902_v20 = vpop.f32.mrb[15].mxu0  ;;  %v932_v15 = vmax.f32 %v908_v5, 0.0 }
 0x87d   :  { %v903_v13 = vadd.f32 %v2492_v47, %v902_v20  ;;  %v930_v16 = vmax.f32 %v900_v14, 0.0 }
 0x87e   :  { %v933_v23 = vmax.f32 %v911_v12, 0.0 }
 0x87f   :  { %v931_v18 = vmax.f32 %v903_v13, 0.0 }
 0x880   :  { %v939_v24 = vpack.c.bf16 %v933_v23, %v932_v15 }
 0x881   :  { %v938_v26 = vpack.c.bf16 %v931_v18, %v930_v16  ;;  %v1806_v25 = vpop.f32.mrb[16].mxu0 }
 0x882   :  { %v924_v27 = vadd.f32 %v1806_v25, %v2492_v47  ;;  %v915_v28 = vpop.f32.mrb[17].mxu0 }
 0x883   :  { %v916_v29 = vadd.f32 %v2492_v47, %v915_v28  ;;  %v1807_v30 = vpop.f32.mrb[18].mxu0  ;;  %1824 = vmatprep.mubr.bf16.mxu0 %v938_v26  ;;  %v2066_v26 = vld [vmem:[#allocation5 + $0x8] sm:$0xff] }
 0x884   :  { %v927_v31 = vadd.f32 %v1807_v30, %v2492_v47  ;;  %v918_v32 = vpop.f32.mrb[19].mxu0  ;;  %1825 = vmatmul.mubr.bf16.vlgmr.msra.gmra.mrb[20].mxu0 %v939_v24  ;;  %v936_v34 = vmax.f32 %v924_v27, 0.0  ;;  %v2067_v27 = vld [vmem:[#allocation5] sm:$0xff] }
 0x885   :  { %v919_v33 = vadd.f32 %v2492_v47, %v918_v32  ;;  %v934_v40 = vmax.f32 %v916_v29, 0.0 }
 0x886   :  { %v937_v39 = vmax.f32 %v927_v31, 0.0  ;;  %v2068_v31 = vld [vmem:[#allocation5 + $0x18] sm:$0xff] }
 0x887   :  { %v935_v41 = vmax.f32 %v919_v33, 0.0 }
 0x888   :  { %v941_v42 = vpack.c.bf16 %v937_v39, %v936_v34  ;;  %v2069_v39 = vld [vmem:[#allocation5 + $0x10] sm:$0xff] }
 0x889   :  { %v940_v43 = vpack.c.bf16 %v935_v41, %v934_v40 }
 0x88b   :  { %1828 = vmatprep.mubr.bf16.mxu0 %v940_v43 }
 0x88c   :  { %1829 = vmatmul.mubr.bf16.gmra.mrb[24].mxu0 %v941_v42 }
 0x88d   :  { %1895 = vmatprep.mubr.msk.bf16.mxu0 %vm2223_vm0, %v2224_v37 }
 0x957   :  { %v1826_v45 = vpop.f32.mrb[20].mxu0 }
 0x958   :  { %v976_v44 = vpop.f32.mrb[21].mxu0  ;;  %v1079_v35 = vmul.f32 %v2064_v19, %v1826_v45 }
 0x959   :  { %v1827_v46 = vpop.f32.mrb[22].mxu0  ;;  %v1077_v21 = vmul.f32 %v2064_v19, %v976_v44 }
 0x95a   :  { %v1945_v47 = vpack.c.bf16 %v1827_v46, %v1826_v45  ;;  %v979_v22 = vpop.f32.mrb[23].mxu0  ;;  %v1080_v53 = vmul.f32 %v2064_v19, %v1827_v46 }
 0x95b   :  { %v1942_v48 = vpack.c.bf16 %v979_v22, %v976_v44  ;;  %1085 = vadd.xlane.f32.xlu0 %v1077_v21  ;;  %v1078_v50 = vmul.f32 %v2064_v19, %v979_v22  ;;  %v2070_v21 = vld [vmem:[#allocation5 + $0x28] sm:$0xff]  ;;  %v2071_v22 = vld [vmem:[#allocation5 + $0x20] sm:$0xff] }
 0x95d   :  { %1087 = vadd.xlane.f32.xlu1 %v1078_v50  ;;  %1943 = vmatpush3.bf16.xpose.msra.mxu1 %v1942_v48 }
 0x95e   :  { %1944 = vmatprep.subr.bf16.mxu1 %v2222_v36 }
 0x95f   :  { %1089 = vadd.xlane.f32.xlu0 %v1079_v35  ;;  %v1830_v52 = vpop.f32.mrb[24].mxu0 }
 0x960   :  { %v992_v54 = vpop.f32.mrb[25].mxu0  ;;  %v1083_v58 = vmul.f32 %v2064_v19, %v1830_v52 }
 0x961   :  { %1091 = vadd.xlane.f32.xlu1 %v1080_v53  ;;  %v1831_v55 = vpop.f32.mrb[26].mxu0  ;;  %v1081_v56 = vmul.f32 %v2064_v19, %v992_v54 }
 0x962   :  { %v1951_v57 = vpack.c.bf16 %v1831_v55, %v1830_v52  ;;  %v995_v49 = vpop.f32.mrb[27].mxu0  ;;  %v1084_v61 = vmul.f32 %v2064_v19, %v1831_v55 }
 0x963   :  { %v1948_v51 = vpack.c.bf16 %v995_v49, %v992_v54  ;;  %1093 = vadd.xlane.f32.xlu0 %v1081_v56  ;;  %v1082_v38 = vmul.f32 %v2064_v19, %v995_v49  ;;  %v2072_v54 = vld [vmem:[#allocation5 + $0x38] sm:$0xff]  ;;  %v2073_v56 = vld [vmem:[#allocation5 + $0x30] sm:$0xff] }
 0x965   :  { %1946 = vmatpush3.bf16.xpose.msra.mxu1 %v1945_v47  ;;  %1095 = vadd.xlane.f32.xlu1 %v1082_v38 }
 0x966   :  { %1947 = vmatprep.subr.bf16.mxu1 %v2222_v36 }
 0x967   :  { %1097 = vadd.xlane.f32.xlu0 %v1083_v58 }
 0x969   :  { %1099 = vadd.xlane.f32.xlu1 %v1084_v61 }
 0x96d   :  { %1949 = vmatpush3.bf16.xpose.msra.mxu1 %v1948_v51 }
 0x96e   :  { %1950 = vmatprep.subr.bf16.mxu1 %v2222_v36 }
 0x975   :  { %1952 = vmatpush3.bf16.xpose.msra.mxu1 %v1951_v57 }
 0x976   :  { %1851 = vmatprep.subr.bf16.mxu1 %v1942_v48 }
 0x97c   :  { %1849 = vmatmul.mubr.f32.vlgmr.msra.gmra.mrb[2].mxu1 %v2065_v63 }
 0x97d   :  { %1852 = vmatpush3.bf16.msra.mxu1 %v1942_v48 }
 0x97e   :  { %1853 = vmatprep.subr.bf16.mxu1 %v1945_v47 }
 0x981   :  { %1854 = vmatpush3.bf16.msra.mxu1 %v1945_v47 }
 0x982   :  { %1855 = vmatprep.subr.bf16.mxu1 %v1948_v51 }
 0x985   :  { %1856 = vmatpush3.bf16.msra.mxu1 %v1948_v51 }
 0x986   :  { %1857 = vmatprep.subr.bf16.mxu1 %v1951_v57 }
 0x989   :  { %1858 = vmatpush3.bf16.msra.mxu1 %v1951_v57 }
 0x98a   :  { %1867 = vmatprep.subr.bf16.mxu1 %v2224_v37 }
 0x9e8   :  { %v1086_v0 = vpop.xlane.xlu0 %1085 }
 0x9ea   :  { %v1088_v1 = vpop.xlane.xlu1 %1087 }
 0x9ec   :  { %v1090_v2 = vpop.xlane.xlu0 %1089 }
 0x9ee   :  { %v1092_v36 = vpop.xlane.xlu1 %1091 }
 0x9f0   :  { %v1094_v60 = vpop.xlane.xlu0 %1093 }
 0x9f2   :  { %v1096_v59 = vpop.xlane.xlu1 %1095 }
 0x9f4   :  { %v1098_v8 = vpop.xlane.xlu0 %1097 }
 0x9f6   :  { %v1100_v9 = vpop.xlane.xlu1 %1099 }
 0xa4f   :  { %v1073_v62 = vpop.f32.mrb[2].mxu1 }
 0xa50   :  { %v1104_v4 = vrot.slane %v1073_v62, %v2426_v6  ;;  %v1850_v7 = vpop.f32.mrb[3].mxu1 }
 0xa52   :  { %v1106_v10 = vadd.f32 %v1104_v4, %v1088_v1  ;;  %v1105_v3 = vadd.f32 %v1104_v4, %v1086_v0  ;;  %v1108_v5 = vadd.f32 %v1104_v4, %v1092_v36  ;;  %v1107_v11 = vadd.f32 %v1104_v4, %v1090_v2 }
 0xa53   :  { %v1110_v14 = vadd.f32 %v1104_v4, %v1096_v59  ;;  %v1109_v17 = vadd.f32 %v1104_v4, %v1094_v60  ;;  %v1112_v12 = vadd.f32 %v1104_v4, %v1100_v9  ;;  %v1111_v20 = vadd.f32 %v1104_v4, %v1098_v8 }
 0xa54   :  { %vm1114_vm4 = vcmp.ge.f32.partialorder %v1106_v10, 0.0  ;;  %v1122_v13 = vmul.f32 0.2, %v1106_v10  ;;  %vm1113_vm5 = vcmp.ge.f32.partialorder %v1105_v3, 0.0  ;;  %v1121_v15 = vmul.f32 0.2, %v1105_v3 }
 0xa55   :  { %vm1116_vm6 = vcmp.ge.f32.partialorder %v1108_v5, 0.0  ;;  %v1124_v23 = vmul.f32 0.2, %v1108_v5  ;;  %vm1115_vm7 = vcmp.ge.f32.partialorder %v1107_v11, 0.0  ;;  %v1123_v16 = vmul.f32 0.2, %v1107_v11 }
 0xa56   :  { %v1130_v6 = vsel %vm1114_vm4, %v1106_v10, %v1122_v13  ;;  %v1129_v18 = vsel %vm1113_vm5, %v1105_v3, %v1121_v15  ;;  %vm1118_vm8 = vcmp.ge.f32.partialorder %v1110_v14, 0.0  ;;  %v1126_v24 = vmul.f32 0.2, %v1110_v14 }
 0xa57   :  { %v1138_v25 = vadd.f32 %v2066_v26, %v1130_v6  ;;  %v1137_v28 = vadd.f32 %v2067_v27, %v1129_v18  ;;  %v1132_v29 = vsel %vm1116_vm6, %v1108_v5, %v1124_v23  ;;  %v1131_v30 = vsel %vm1115_vm7, %v1107_v11, %v1123_v16 }
 0xa58   :  { %v1140_v32 = vadd.f32 %v2068_v31, %v1132_v29  ;;  %vm1117_vm9 = vcmp.ge.f32.partialorder %v1109_v17, 0.0  ;;  %v1139_v40 = vadd.f32 %v2069_v39, %v1131_v30  ;;  %v1125_v41 = vmul.f32 0.2, %v1109_v17 }
 0xa59   :  { %v1148_v33 = vsel %vm362_vm1, %v1138_v25, -inf  ;;  %v1145_v34 = vsel %vm362_vm1, %v1137_v28, -inf  ;;  %v1134_v42 = vsel %vm1118_vm8, %v1110_v14, %v1126_v24  ;;  %v1128_v43 = vmul.f32 0.2, %v1112_v12 }
 0xa5a   :  { %1149 = vmax.xlane.f32.xlu1 %v1148_v33  ;;  %1146 = vmax.xlane.f32.xlu0 %v1145_v34  ;;  %v1133_v45 = vsel %vm1117_vm9, %v1109_v17, %v1125_v41  ;;  %vm1120_vm10 = vcmp.ge.f32.partialorder %v1112_v12, 0.0  ;;  %vm1119_vm11 = vcmp.ge.f32.partialorder %v1111_v20, 0.0  ;;  %v1127_v44 = vmul.f32 0.2, %v1111_v20 }
 0xa5b   :  { %v1154_v46 = vsel %vm362_vm1, %v1140_v32, -inf  ;;  %v1151_v19 = vsel %vm362_vm1, %v1139_v40, -inf  ;;  %v1142_v47 = vadd.f32 %v2070_v21, %v1134_v42  ;;  %v1141_v48 = vadd.f32 %v2071_v22, %v1133_v45 }
 0xa5c   :  { %v1136_v50 = vsel %vm1120_vm10, %v1112_v12, %v1128_v43  ;;  %v1135_v35 = vsel %vm1119_vm11, %v1111_v20, %v1127_v44 }
 0xa5d   :  { %v1160_v52 = vsel %vm362_vm1, %v1142_v47, -inf  ;;  %v1157_v53 = vsel %vm362_vm1, %v1141_v48, -inf  ;;  %v1144_v55 = vadd.f32 %v2072_v54, %v1136_v50  ;;  %v1143_v57 = vadd.f32 %v2073_v56, %v1135_v35  ;;  %v1328_v35 = vld [vmem:[#allocation10] sm:$0xff] }
 0xa5e   :  { %1155 = vmax.xlane.f32.xlu1 %v1154_v46  ;;  %1152 = vmax.xlane.f32.xlu0 %v1151_v19 }
 0xa5f   :  { %v1166_v49 = vsel %vm362_vm1, %v1144_v55, -inf  ;;  %v1163_v51 = vsel %vm362_vm1, %v1143_v57, -inf }
 0xa62   :  { %1161 = vmax.xlane.f32.xlu1 %v1160_v52  ;;  %1158 = vmax.xlane.f32.xlu0 %v1157_v53  ;;  %v1329_v52 = vld [vmem:[#allocation10 + $0x8] sm:$0xff] }
 0xa63   :  { %v1344_v56 = vpack.c.bf16 %v1329_v52, %v1328_v35 }
 0xa66   :  { %1167 = vmax.xlane.f32.xlu1 %v1166_v49  ;;  %1164 = vmax.xlane.f32.xlu0 %v1163_v51  ;;  %v1330_v51 = vld [vmem:[#allocation10 + $0x10] sm:$0xff] }
 0xae7   :  { %v1150_v38 = vpop.xlane.xlu1 %1149  ;;  %v1147_v58 = vpop.xlane.xlu0 %1146 }
 0xae8   :  { %v1170_v61 = vsub.f32 %v1138_v25, %v1150_v38  ;;  %v1169_v63 = vsub.f32 %v1137_v28, %v1147_v58  ;;  %v1331_v38 = vld [vmem:[#allocation10 + $0x18] sm:$0xff] }
 0xaea   :  { %v1179_v0 = vmul.f32 1.442695, %v1170_v61  ;;  %v1177_v1 = vmul.f32 1.442695, %v1169_v63 }
 0xaeb   :  { %v1156_v2 = vpop.xlane.xlu1 %1155  ;;  %v1153_v36 = vpop.xlane.xlu0 %1152 }
 0xaec   :  { %2028 = vpow2.f32 %v1179_v0  ;;  %v1172_v60 = vsub.f32 %v1140_v32, %v1156_v2  ;;  %v1171_v59 = vsub.f32 %v1139_v40, %v1153_v36  ;;  %v1345_v0 = vpack.c.bf16 %v1331_v38, %v1330_v51  ;;  %v1332_v36 = vld [vmem:[#allocation10 + $0x20] sm:$0xff] }
 0xaed   :  { %2030 = vpow2.f32 %v1177_v1 }
 0xaee   :  { %v1183_v62 = vmul.f32 1.442695, %v1172_v60  ;;  %v1181_v4 = vmul.f32 1.442695, %v1171_v59  ;;  %v1333_v60 = vld [vmem:[#allocation10 + $0x28] sm:$0xff] }
 0xaef   :  { %v1162_v7 = vpop.xlane.xlu1 %1161  ;;  %v1159_v8 = vpop.xlane.xlu0 %1158 }
 0xaf0   :  { %2032 = vpow2.f32 %v1183_v62  ;;  %v1174_v9 = vsub.f32 %v1142_v47, %v1162_v7  ;;  %v1173_v10 = vsub.f32 %v1141_v48, %v1159_v8  ;;  %v1346_v7 = vpack.c.bf16 %v1333_v60, %v1332_v36 }
 0xaf1   :  { %2034 = vpow2.f32 %v1181_v4 }
 0xaf2   :  { %v1187_v3 = vmul.f32 1.442695, %v1174_v9  ;;  %v1185_v5 = vmul.f32 1.442695, %v1173_v10  ;;  %v1334_v9 = vld [vmem:[#allocation10 + $0x30] sm:$0xff]  ;;  %v1335_v10 = vld [vmem:[#allocation10 + $0x38] sm:$0xff] }
 0xaf3   :  { %v1168_v11 = vpop.xlane.xlu1 %1167  ;;  %v1165_v14 = vpop.xlane.xlu0 %1164 }
 0xaf4   :  { %2036 = vpow2.f32 %v1187_v3  ;;  %v1176_v17 = vsub.f32 %v1144_v55, %v1168_v11  ;;  %v1175_v12 = vsub.f32 %v1143_v57, %v1165_v14  ;;  %v1347_v3 = vpack.c.bf16 %v1335_v10, %v1334_v9  ;;  %v1337_v11 = vld [vmem:[#allocation10 + $0x48] sm:$0xff]  ;;  %v1498_v10 = vld [vmem:[%s2664_s9 + $0x8] sm:$0xff] }
 0xaf5   :  { %2038 = vpow2.f32 %v1185_v5  ;;  %v1336_v5 = vld [vmem:[#allocation10 + $0x40] sm:$0xff] }
 0xaf6   :  { %v2029_v20 = vpop.eup %2028  ;;  %v1191_v13 = vmul.f32 1.442695, %v1176_v17  ;;  %v1189_v15 = vmul.f32 1.442695, %v1175_v12  ;;  %v1348_v14 = vpack.c.bf16 %v1337_v11, %v1336_v5  ;;  %v1338_v17 = vld [vmem:[#allocation10 + $0x50] sm:$0xff]  ;;  %v1339_v12 = vld [vmem:[#allocation10 + $0x58] sm:$0xff] }
 0xaf7   :  { %v2031_v23 = vpop.eup %2030  ;;  %v1196_v16 = vsel %vm362_vm1, %v2029_v20, 0.0 }
 0xaf8   :  { %2040 = vpow2.f32 %v1191_v13  ;;  %1197 = vadd.xlane.f32.xlu1 %v1196_v16  ;;  %v1193_v6 = vsel %vm362_vm1, %v2031_v23, 0.0  ;;  %v1340_v13 = vld [vmem:[#allocation10 + $0x60] sm:$0xff]  ;;  %v1342_v16 = vld [vmem:[#allocation10 + $0x70] sm:$0xff] }
 0xaf9   :  { %2042 = vpow2.f32 %v1189_v15  ;;  %1194 = vadd.xlane.f32.xlu0 %v1193_v6  ;;  %v1341_v15 = vld [vmem:[#allocation10 + $0x68] sm:$0xff]  ;;  %v1343_v6 = vld [vmem:[#allocation10 + $0x78] sm:$0xff] }
 0xafa   :  { %v2033_v18 = vpop.eup %2032 }
 0xafb   :  { %v2035_v24 = vpop.eup %2034  ;;  %v1202_v26 = vsel %vm362_vm1, %v2033_v18, 0.0 }
 0xafc   :  { %1203 = vadd.xlane.f32.xlu1 %v1202_v26  ;;  %v1199_v25 = vsel %vm362_vm1, %v2035_v24, 0.0 }
 0xafd   :  { %1200 = vadd.xlane.f32.xlu0 %v1199_v25 }
 0xafe   :  { %v2037_v27 = vpop.eup %2036 }
 0xaff   :  { %v2039_v28 = vpop.eup %2038  ;;  %v1208_v29 = vsel %vm362_vm1, %v2037_v27, 0.0 }
 0xb00   :  { %1209 = vadd.xlane.f32.xlu1 %v1208_v29  ;;  %v1205_v30 = vsel %vm362_vm1, %v2039_v28, 0.0 }
 0xb01   :  { %1206 = vadd.xlane.f32.xlu0 %v1205_v30 }
 0xb02   :  { %v2041_v31 = vpop.eup %2040 }
 0xb03   :  { %v2043_v32 = vpop.eup %2042  ;;  %v1214_v33 = vsel %vm362_vm1, %v2041_v31, 0.0 }
 0xb04   :  { %1215 = vadd.xlane.f32.xlu1 %v1214_v33  ;;  %v1211_v34 = vsel %vm362_vm1, %v2043_v32, 0.0 }
 0xb05   :  { %1212 = vadd.xlane.f32.xlu0 %v1211_v34 }
 0xb85   :  { %v1198_v39 = vpop.xlane.xlu1 %1197 }
 0xb86   :  { %2044 = vrcp.f32 %v1198_v39  ;;  %v1195_v40 = vpop.xlane.xlu0 %1194 }
 0xb87   :  { %2046 = vrcp.f32 %v1195_v40 }
 0xb89   :  { %v1204_v41 = vpop.xlane.xlu1 %1203 }
 0xb8a   :  { %2048 = vrcp.f32 %v1204_v41  ;;  %v1201_v42 = vpop.xlane.xlu0 %1200 }
 0xb8b   :  { %2050 = vrcp.f32 %v1201_v42 }
 0xb8d   :  { %v1210_v43 = vpop.xlane.xlu1 %1209 }
 0xb8e   :  { %2052 = vrcp.f32 %v1210_v43  ;;  %v1207_v45 = vpop.xlane.xlu0 %1206 }
 0xb8f   :  { %2054 = vrcp.f32 %v1207_v45 }
 0xb90   :  { %v2045_v44 = vpop.eup %2044 }
 0xb91   :  { %v2047_v46 = vpop.eup %2046  ;;  %v1216_v19 = vpop.xlane.xlu1 %1215  ;;  %v1226_v21 = vmul.f32 %v2045_v44, %v2029_v20  ;;  %v1349_v20 = vpack.c.bf16 %v1339_v12, %v1338_v17 }
 0xb92   :  { %2056 = vrcp.f32 %v1216_v19  ;;  %v1213_v47 = vpop.xlane.xlu0 %1212  ;;  %v1225_v22 = vmul.f32 %v2047_v46, %v2031_v23  ;;  %v1350_v23 = vpack.c.bf16 %v1341_v15, %v1340_v13 }
 0xb93   :  { %2058 = vrcp.f32 %v1213_v47 }
 0xb94   :  { %v2049_v48 = vpop.eup %2048  ;;  %v1233_v50 = vpack.c.bf16 %v1226_v21, %v1225_v22 }
 0xb95   :  { %v2051_v53 = vpop.eup %2050  ;;  %v1228_v54 = vmul.f32 %v2049_v48, %v2033_v18  ;;  %v1351_v18 = vpack.c.bf16 %v1343_v6, %v1342_v16  ;;  %v1581_v6 = vld [vmem:[%s2665_s10] ss:$0 sm:$0xff] }
 0xb96   :  { %v1227_v55 = vmul.f32 %v2051_v53, %v2035_v24  ;;  %1859 = vmatprep.mubr.msk.bf16.mxu1 %vm362_vm1, %v1233_v50  ;;  %v1326_v24 = vld [vmem:[%s2661_s6] sm:$0xff] }
 0xb97   :  { %v1327_v26 = vpack.c.bf16 %v1326_v24, %v1326_v24 }
 0xb98   :  { %v2053_v57 = vpop.eup %2052  ;;  %v1234_v49 = vpack.c.bf16 %v1228_v54, %v1227_v55 }
 0xb99   :  { %v2055_v58 = vpop.eup %2054  ;;  %v1230_v61 = vmul.f32 %v2053_v57, %v2037_v27  ;;  %v2074_v27 = vld [vmem:[%s2660_s5] ss:$0 sm:$0xff] }
 0xb9a   :  { %1860 = vmatmul.mubr.msk.bf16.vlgmr.msra.gmra.mrb[20].mxu1 %vm362_vm1, %v1234_v49  ;;  %v1229_v63 = vmul.f32 %v2055_v58, %v2039_v28 }
 0xb9b   :  { %1868 = vmatpush3.bf16.msra.mxu1 %v1344_v56 }
 0xb9c   :  { %v2057_v1 = vpop.eup %2056  ;;  %v1235_v2 = vpack.c.bf16 %v1230_v61, %v1229_v63  ;;  %1869 = vmatprep.subr.bf16.mxu1 %v2224_v37  ;;  %v1438_v63 = vld [vmem:[#allocation8] sm:$0xff] }
 0xb9d   :  { %v2059_v59 = vpop.eup %2058  ;;  %v1232_v62 = vmul.f32 %v2057_v1, %v2041_v31 }
 0xb9e   :  { %1863 = vmatprep.mubr.msk.bf16.mxu1 %vm362_vm1, %v1235_v2  ;;  %v1231_v4 = vmul.f32 %v2059_v59, %v2043_v32 }
 0xb9f   :  { %1870 = vmatpush3.bf16.msra.mxu1 %v1345_v0 }
 0xba0   :  { %v1236_v8 = vpack.c.bf16 %v1232_v62, %v1231_v4  ;;  %1871 = vmatprep.subr.bf16.mxu1 %v2224_v37 }
 0xba2   :  { %1864 = vmatmul.mubr.msk.bf16.gmra.mrb[24].mxu1 %vm362_vm1, %v1236_v8 }
 0xba3   :  { %1872 = vmatpush3.bf16.msra.mxu1 %v1346_v7  ;;  %1883 = vmatprep.mubr.msk.bf16.mxu1 %vm2223_vm0, %v2224_v37 }
 0xba4   :  { %1873 = vmatprep.subr.bf16.mxu1 %v2224_v37 }
 0xba7   :  { %1874 = vmatpush3.bf16.msra.mxu1 %v1347_v3 }
 0xba8   :  { %1875 = vmatprep.subr.bf16.mxu1 %v2224_v37 }
 0xbab   :  { %1876 = vmatpush3.bf16.msra.mxu1 %v1348_v14 }
 0xbac   :  { %1877 = vmatprep.subr.bf16.mxu1 %v2224_v37 }
 0xbaf   :  { %1878 = vmatpush3.bf16.msra.mxu1 %v1349_v20 }
 0xbb0   :  { %1879 = vmatprep.subr.bf16.mxu1 %v2224_v37 }
 0xbb3   :  { %1880 = vmatpush3.bf16.msra.mxu1 %v1350_v23 }
 0xbb4   :  { %1881 = vmatprep.subr.bf16.mxu1 %v2224_v37 }
 0xbb7   :  { %1882 = vmatpush3.bf16.msra.mxu1 %v1351_v18 }
 0xbb8   :  { %1899 = vmatprep.subr.bf16.mxu1 %v2224_v37 }
 0xbba   :  { %1884 = vmatmul.mubr.bf16.vlgmr.msra.gmra.mrb[28].mxu1 %v1327_v26 }
 0xbbb   :  { %1907 = vmatprep.mubr.msk.bf16.mxu1 %vm2223_vm0, %v2224_v37 }
 0xc6d   :  { %v1861_v25 = vpop.f32.mrb[20].mxu1 }
 0xc6e   :  { %v1296_v28 = vadd.f32 %v2074_v27, %v1861_v25  ;;  %v1287_v29 = vpop.f32.mrb[21].mxu1 }
 0xc6f   :  { %v1288_v30 = vadd.f32 %v2074_v27, %v1287_v29  ;;  %v1862_v31 = vpop.f32.mrb[22].mxu1 }
 0xc70   :  { %v1299_v32 = vadd.f32 %v2074_v27, %v1862_v31  ;;  %v1290_v33 = vpop.f32.mrb[23].mxu1  ;;  %v1320_v39 = vmax.f32 %v1296_v28, 0.0 }
 0xc71   :  { %v1291_v34 = vadd.f32 %v2074_v27, %v1290_v33  ;;  %v1318_v41 = vmax.f32 %v1288_v30, 0.0 }
 0xc72   :  { %v1321_v40 = vmax.f32 %v1299_v32, 0.0 }
 0xc73   :  { %v1319_v42 = vmax.f32 %v1291_v34, 0.0 }
 0xc74   :  { %v1394_v43 = vpack.c.bf16 %v1321_v40, %v1320_v39 }
 0xc75   :  { %v1393_v45 = vpack.c.bf16 %v1319_v42, %v1318_v41  ;;  %v1865_v44 = vpop.f32.mrb[24].mxu1 }
 0xc76   :  { %v1312_v46 = vadd.f32 %v2074_v27, %v1865_v44  ;;  %v1303_v19 = vpop.f32.mrb[25].mxu1 }
 0xc77   :  { %v1304_v21 = vadd.f32 %v2074_v27, %v1303_v19  ;;  %v1866_v47 = vpop.f32.mrb[26].mxu1  ;;  %1888 = vmatpush3.bf16.xpose.msra.mxu0 %v1393_v45  ;;  %1900 = vmatpush3.bf16.msra.mxu1 %v1393_v45 }
 0xc78   :  { %v1315_v22 = vadd.f32 %v2074_v27, %v1866_v47  ;;  %v1306_v48 = vpop.f32.mrb[27].mxu1  ;;  %1901 = vmatprep.subr.bf16.mxu1 %v2224_v37  ;;  %1889 = vmatprep.subr.bf16.mxu0 %v2224_v37  ;;  %v1324_v35 = vmax.f32 %v1312_v46, 0.0 }
 0xc79   :  { %v1307_v50 = vadd.f32 %v2074_v27, %v1306_v48  ;;  %v1322_v53 = vmax.f32 %v1304_v21, 0.0 }
 0xc7a   :  { %v1325_v52 = vmax.f32 %v1315_v22, 0.0 }
 0xc7b   :  { %v1323_v54 = vmax.f32 %v1307_v50, 0.0  ;;  %1902 = vmatpush3.bf16.msra.mxu1 %v1394_v43 }
 0xc7c   :  { %v1396_v55 = vpack.c.bf16 %v1325_v52, %v1324_v35  ;;  %1903 = vmatprep.subr.bf16.mxu1 %v2224_v37 }
 0xc7d   :  { %v1395_v56 = vpack.c.bf16 %v1323_v54, %v1322_v53 }
 0xc7f   :  { %1890 = vmatpush3.bf16.xpose.msra.mxu0 %v1394_v43  ;;  %1904 = vmatpush3.bf16.msra.mxu1 %v1395_v56 }
 0xc80   :  { %1905 = vmatprep.subr.bf16.mxu1 %v2224_v37  ;;  %1891 = vmatprep.subr.bf16.mxu0 %v2224_v37 }
 0xc83   :  { %1906 = vmatpush3.bf16.msra.mxu1 %v1396_v55 }
 0xc87   :  { %1892 = vmatpush3.bf16.xpose.msra.mxu0 %v1395_v56 }
 0xc88   :  { %1893 = vmatprep.subr.bf16.mxu0 %v2224_v37 }
 0xc8d   :  { %v1386_v57 = vpop.f32.mrb[28].mxu1 }
 0xc8e   :  { %v1885_v49 = vpop.f32.mrb[29].mxu1  ;;  %v1392_v58 = vpack.c.bf16 %v1386_v57, %v1386_v57 }
 0xc8f   :  { %1894 = vmatpush3.bf16.xpose.msra.mxu0 %v1396_v55  ;;  %v1389_v51 = vpop.f32.mrb[30].mxu1 }
 0xc90   :  { %v1886_v38 = vpop.f32.mrb[31].mxu1  ;;  %1911 = vmatprep.subr.bf16.mxu0 %v2224_v37 }
 0xc96   :  { %1896 = vmatmul.mubr.bf16.vlgmr.msra.gmra.mrb[28].mxu0 %v1392_v58 }
 0xc97   :  { %1913 = vmatprep.mubr.msk.bf16.mxu0 %vm2223_vm0, %v2224_v37  ;;  %v1497_v37 = vld [vmem:[%s2664_s9] sm:$0xff]  ;;  %s2225_s9 = smov [#allocation11]   ;;  %vm1547_vm0 = vcmask 130048  }
 0xc98   :  { %v1499_v3 = vpack.c.bf16 %v1498_v10, %v1497_v37  ;;  %s1555_s16 = sshll.u32 %s2225_s9, 4  ;;  %s1556_s16 = int_to_ptr.vmem [resolvable:$true] %s1555_s16 }
 0xc99   :  { %s2185_s17 = scalar_lea.vmem %s1556_s16, 128  ;;  %p2190_p13 = scmp.lt.s32.totalorder %s1556_s16, %s1556_s16 }
 0xc9a   :  { %1912 = vmatpush3.bf16.xpose.msra.mxu0 %v1499_v3  ;;  %p2186_p12 = scmp.ne.s32.totalorder %s1556_s16, %s2185_s17  ;;  %p2191_p0 = scmp.lt.s32.totalorder %s2185_s17, %s2185_s17 }
 0xc9c   :  { %p2192_p1 = por %p2191_p0, %p2190_p13 }
 0xc9e   :  { %p2193_p2 = pnand %p2192_p1, %p2186_p12 }
 0xd69   :  { %v1431_v61 = vpop.f32.mrb[28].mxu0 }
 0xd6a   :  { %v1437_v0 = vmul.f32 0.088388346, %v1431_v61  ;;  %v1897_v1 = vpop.f32.mrb[29].mxu0 }
 0xd6b   :  { %v1434_v2 = vpop.f32.mrb[30].mxu0 }
 0xd6c   :  { %v1898_v36 = vpop.f32.mrb[31].mxu0  ;;  %v1439_v60 = vadd.f32 %v1438_v63, %v1437_v0 }
 0xd6e   :  { %v1440_v59 = vsel %vm362_vm1, %v1439_v60, -inf }
 0xd6f   :  { %1441 = vmax.xlane.f32.xlu0 %v1440_v59 }
 0xdfc   :  { %v1442_v62 = vpop.xlane.xlu0 %1441 }
 0xdfd   :  { %v1443_v4 = vsub.f32 %v1439_v60, %v1442_v62 }
 0xdff   :  { %v1444_v7 = vmul.f32 1.442695, %v1443_v4 }
 0xe01   :  { %2060 = vpow2.f32 %v1444_v7 }
 0xe0b   :  { %v2061_v8 = vpop.eup %2060 }
 0xe0c   :  { %v1446_v9 = vsel %vm362_vm1, %v2061_v8, 0.0 }
 0xe0d   :  { %1447 = vadd.xlane.f32.xlu1 %v1446_v9 }
 0xe9a   :  { %v1448_v5 = vpop.xlane.xlu1 %1447 }
 0xe9b   :  { %2062 = vrcp.f32 %v1448_v5 }
 0xea5   :  { %v2063_v11 = vpop.eup %2062 }
 0xea6   :  { %v1450_v14 = vmul.f32 %v2063_v11, %v2061_v8 }
 0xea8   :  { %v1451_v17 = vpack.c.bf16 %v1450_v14, %v1450_v14 }
 0xeaa   :  { %1908 = vmatmul.mubr.msk.bf16.vlgmr.msra.gmra.mrb[32].mxu1 %vm362_vm1, %v1451_v17 }
 0xf7d   :  { %v1489_v12 = vpop.f32.mrb[32].mxu1 }
 0xf7e   :  { %v1495_v20 = vmax.f32 %v1489_v12, 0.0  ;;  %v1909_v13 = vpop.f32.mrb[33].mxu1 }
 0xf7f   :  { %v1492_v15 = vpop.f32.mrb[34].mxu1 }
 0xf80   :  { %v1496_v23 = vpack.c.bf16 %v1495_v20, %v1495_v20  ;;  %v1910_v16 = vpop.f32.mrb[35].mxu1 }
 0xf82   :  { %1914 = vmatmul.mubr.bf16.vlgmr.msra.gmra.mrb[32].mxu0 %v1496_v23 }
0x1055   :  { %v1541_v18 = vpop.f32.mrb[32].mxu0 }
0x1056   :  { %v1542_v24 = vadd.f32 %v1581_v6, %v1541_v18  ;;  %v1915_v26 = vpop.f32.mrb[33].mxu0 }
0x1057   :  { %v1544_v25 = vpop.f32.mrb[34].mxu0 }
0x1058   :  { %v1916_v27 = vpop.f32.mrb[35].mxu0  ;;  %1548 = vst.msk [vmem:[#allocation11] sm:$0xff] %vm1547_vm0, %v1542_v24 }
0x1059   :  { %2196 = shalt.err (!%p2193_p2)
}
0x105a   :  { %s2197_s10 = scalar_lea.hbm %s2666_s11, 128 }
0x105b   :  { %p2198_p3 = scmp.ne.s32.totalorder %s2666_s11, %s2197_s10  ;;  %p2201_p4 = scmp.lt.u32.totalorder %s2197_s10, %s2666_s11 }
0x105d   :  { %p2203_p5 = pnand %p2201_p4, %p2198_p3 }
0x105f   :  { %2206 = shalt.err (!%p2203_p5)
}
0x1060   :  { %1558 = dma.vmem_to_hbm [thread:$0]  %s1556_s16, 128, %s2666_s11, [#allocation4]  }
0x1061   :  { %2213 = dma.done.wait [#allocation4], 128  }
0x1062   :  { %2214 = vsyncadd [#allocation4], 4294967168 }
0x1063   :  { %1562 = vsyncpa [#allocation3], 1 }
0x1064   :  { %1563 = vsyncpa [#allocation6], 1 }
0x1065   :  { %1564 = vsyncpa [#allocation9], 1 }
0x1066   :  { %1565 = vsyncpa [#allocation4], 1 }

</bundles_post_ra>
